<compile_context>
chip_gen: v6e
topology: v6e:2x2x1
jax: 0.10.0
libtpu: 0.0.40
codegen_flags: <defaults>
</compile_context>

<pallas_src>
import jax
import jax.numpy as jnp
from jax import lax
from jax.experimental import pallas as pl
from jax.experimental.pallas import tpu as pltpu


_VMEM_SPEC = pl.BlockSpec(memory_space=pltpu.MemorySpace.VMEM)


# ----------------------------------------------------------------------------
# Fused whole-model kernel
# ----------------------------------------------------------------------------
def _make_fused_lstm_kernel(n_layers, T, B, H):
    """Builds a kernel running n_layers stacked LSTMs + FC head in one body.

    Ref order: x (T,B,D0), then per layer [w_ih_t (D,4H), w_hh_t (H,4H),
    b (1,4H)], then fc_w_t (H,C), fc_b (1,C), then out (B,C).
    """

    def kernel(*refs):
        x_ref = refs[0]
        layer_refs = refs[1:1 + 3 * n_layers]
        fcw_ref = refs[1 + 3 * n_layers]
        fcb_ref = refs[2 + 3 * n_layers]
        out_ref = refs[3 + 3 * n_layers]

        # Hoisted per-lane constants: sigmoid(x) = 0.5*(1 + tanh(x/2)), so with
        #   scale = 0.5 (i/f/o lanes) or 1.0 (g lanes)
        #   shift = 0.5 (i/f/o lanes) or 0.0 (g lanes)
        # act = tanh(gates*scale)*scale + shift gives sigmoid on i/f/o and
        # tanh on g with a single full-(4H)-wide tanh per step.
        lane = lax.broadcasted_iota(jnp.int32, (1, 4 * H), 1)
        is_g = (lane >= 2 * H) & (lane < 3 * H)
        scale = jnp.where(is_g, 1.0, 0.5).astype(jnp.float32)
        shift = jnp.where(is_g, 0.0, 0.5).astype(jnp.float32)

        xv = x_ref[...].astype(jnp.float32)            # (T, B, D0)
        xs = [xv[t] for t in range(T)]                 # list of (B, D) values

        for l in range(n_layers):
            w_ih_t = layer_refs[3 * l][...]            # (D, 4H)
            w_hh_t = layer_refs[3 * l + 1][...]        # (H, 4H)
            b = layer_refs[3 * l + 2][...]             # (1, 4H), b_ih + b_hh

            h = jnp.zeros((B, H), jnp.float32)
            c = jnp.zeros((B, H), jnp.float32)
            outs = []
            # Fully unrolled: the x_t @ W_ih matmuls have no serial dependence
            # on h, so the scheduler can overlap them with the recurrent
            # h @ W_hh matmul + EUP work of earlier steps.
            for t in range(T):
                gates = (
                    jnp.dot(xs[t], w_ih_t, preferred_element_type=jnp.float32)
                    + jnp.dot(h, w_hh_t, preferred_element_type=jnp.float32)
                    + b
                )                                      # (B, 4H)
                act = jnp.tanh(gates * scale) * scale + shift
                i_g = act[:, 0 * H:1 * H]
                f_g = act[:, 1 * H:2 * H]
                g_g = act[:, 2 * H:3 * H]
                o_g = act[:, 3 * H:4 * H]
                c = f_g * c + i_g * g_g
                h = o_g * jnp.tanh(c)
                outs.append(h)
            xs = outs                                  # next layer's inputs stay on-chip

        # FC head fused on the final hidden state of the top layer only.
        out_ref[...] = (
            jnp.dot(xs[-1], fcw_ref[...], preferred_element_type=jnp.float32)
            + fcb_ref[...]
        )

    return kernel


# ----------------------------------------------------------------------------
# Wrapper
# ----------------------------------------------------------------------------
@jax.jit
def lstm_model_forward(x, params):
    """Equivalent of LSTMModel.forward: x (B, T, input_size) -> (B, num_classes)."""
    x = x.astype(jnp.float32)
    B, T, _ = x.shape
    seq = jnp.transpose(x, (1, 0, 2))                  # time-major (T, B, D)

    n_layers = len(params["lstm"])
    H = params["lstm"][0]["w_hh_t"].shape[0]
    C = params["fc_w_t"].shape[1]

    args = [seq]
    for layer in params["lstm"]:
        args += [layer["w_ih_t"], layer["w_hh_t"], layer["b"]]
    args += [params["fc_w_t"], params["fc_b"]]

    kernel = _make_fused_lstm_kernel(n_layers, T, B, H)
    return pl.pallas_call(
        kernel,
        out_shape=jax.ShapeDtypeStruct((B, C), jnp.float32),
        in_specs=[_VMEM_SPEC] * len(args),
        out_specs=_VMEM_SPEC,
    )(*args)


# ----------------------------------------------------------------------------
# Deterministic parameter init (PyTorch-style U(-1/sqrt(H), 1/sqrt(H)))
# Weights stored pre-transposed (lane-dense 4H / C last dim); biases folded.
# ----------------------------------------------------------------------------
def init_params(key, input_size, hidden_size, num_classes, num_layers=2):
    bound = 1.0 / float(hidden_size) ** 0.5
    layers = []
    for layer_idx in range(num_layers):
        d_in = input_size if layer_idx == 0 else hidden_size
        key, k1, k2, k3, k4 = jax.random.split(key, 5)
        w_ih = jax.random.uniform(k1, (4 * hidden_size, d_in), jnp.float32, -bound, bound)
        w_hh = jax.random.uniform(k2, (4 * hidden_size, hidden_size), jnp.float32, -bound, bound)
        b_ih = jax.random.uniform(k3, (4 * hidden_size,), jnp.float32, -bound, bound)
        b_hh = jax.random.uniform(k4, (4 * hidden_size,), jnp.float32, -bound, bound)
        layers.append({
            "w_ih_t": jnp.asarray(w_ih.T),                       # (d_in, 4H)
            "w_hh_t": jnp.asarray(w_hh.T),                       # (H, 4H)
            "b": (b_ih + b_hh).reshape(1, 4 * hidden_size),      # (1, 4H)
        })
    key, kf1, kf2 = jax.random.split(key, 3)
    fc_w = jax.random.uniform(kf1, (num_classes, hidden_size), jnp.float32, -bound, bound)
    fc_b = jax.random.uniform(kf2, (num_classes,), jnp.float32, -bound, bound)
    return {
        "lstm": layers,
        "fc_w_t": jnp.asarray(fc_w.T),                           # (H, C)
        "fc_b": fc_b.reshape(1, num_classes),                    # (1, C)
    }


# ----------------------------------------------------------------------------
# Pure-JAX reference (correctness check only)
# ----------------------------------------------------------------------------
def reference_forward(x, params):
    x = x.astype(jnp.float32)
    B = x.shape[0]
    seq = jnp.transpose(x, (1, 0, 2))
    for layer in params["lstm"]:
        H = layer["w_hh_t"].shape[0]
        h = jnp.zeros((B, H), jnp.float32)
        c = jnp.zeros((B, H), jnp.float32)
        outs = []
        for t in range(seq.shape[0]):
            gates = seq[t] @ layer["w_ih_t"] + h @ layer["w_hh_t"] + layer["b"]
            i_g = jax.nn.sigmoid(gates[:, 0 * H:1 * H])
            f_g = jax.nn.sigmoid(gates[:, 1 * H:2 * H])
            g_g = jnp.tanh(gates[:, 2 * H:3 * H])
            o_g = jax.nn.sigmoid(gates[:, 3 * H:4 * H])
            c = f_g * c + i_g * g_g
            h = o_g * jnp.tanh(c)
            outs.append(h)
        seq = jnp.stack(outs, axis=0)
    return seq[-1] @ params["fc_w_t"] + params["fc_b"]


if __name__ == "__main__":
    INPUT_SIZE = 16
    HIDDEN_SIZE = 32
    NUM_CLASSES = 10
    NUM_LAYERS = 2
    BATCH = 2
    SEQ = 8

    key = jax.random.PRNGKey(0)
    key, xkey, pkey = jax.random.split(key, 3)
    x = jax.random.normal(xkey, (BATCH, SEQ, INPUT_SIZE), jnp.float32)
    params = init_params(pkey, INPUT_SIZE, HIDDEN_SIZE, NUM_CLASSES, NUM_LAYERS)

    out = lstm_model_forward(x, params)
    out = jax.block_until_ready(out)
    assert out.shape == (BATCH, NUM_CLASSES), out.shape

    ref = reference_forward(x, params)
    assert jnp.allclose(out, ref, rtol=1e-4, atol=1e-4), (out, ref)

    print("KERNEL_OK")
</pallas_src>

<mosaic_0001>
module attributes {stable_mosaic.version = 11 : i64} {
  func.func @kernel(%arg0: memref<8x2x16xf32, #tpu.memory_space<vmem>>, %arg1: memref<16x128xf32, #tpu.memory_space<vmem>>, %arg2: memref<32x128xf32, #tpu.memory_space<vmem>>, %arg3: memref<1x128xf32, #tpu.memory_space<vmem>>, %arg4: memref<32x128xf32, #tpu.memory_space<vmem>>, %arg5: memref<32x128xf32, #tpu.memory_space<vmem>>, %arg6: memref<1x128xf32, #tpu.memory_space<vmem>>, %arg7: memref<32x10xf32, #tpu.memory_space<vmem>>, %arg8: memref<1x10xf32, #tpu.memory_space<vmem>>, %arg9: memref<2x10xf32, #tpu.memory_space<vmem>>) attributes {dimension_semantics = [], scalar_prefetch = 0 : i64, scratch_operands = 0 : i64, tpu.core_type = #tpu.core_type<tc>} {
    %0 = tpu.iota {dimensions = array<i32: 1>} : vector<1x128xi32>
    %c64_i32 = arith.constant 64 : i32
    %1 = vector.broadcast %c64_i32 : i32 to vector<1x128xi32>
    %2 = arith.cmpi sge, %0, %1 : vector<1x128xi32>
    %c96_i32 = arith.constant 96 : i32
    %3 = vector.broadcast %c96_i32 : i32 to vector<1x128xi32>
    %4 = arith.cmpi slt, %0, %3 : vector<1x128xi32>
    %5 = arith.andi %2, %4 : vector<1x128xi1>
    %cst = arith.constant 1.000000e+00 : f32
    %cst_0 = arith.constant 5.000000e-01 : f32
    %6 = vector.broadcast %cst : f32 to vector<1x128xf32>
    %7 = vector.broadcast %cst_0 : f32 to vector<1x128xf32>
    %8 = arith.select %5, %6, %7 : vector<1x128xi1>, vector<1x128xf32>
    %cst_1 = arith.constant 0.000000e+00 : f32
    %cst_2 = arith.constant 5.000000e-01 : f32
    %9 = vector.broadcast %cst_1 : f32 to vector<1x128xf32>
    %10 = vector.broadcast %cst_2 : f32 to vector<1x128xf32>
    %11 = arith.select %5, %9, %10 : vector<1x128xi1>, vector<1x128xf32>
    %c0 = arith.constant 0 : index
    %c0_3 = arith.constant 0 : index
    %c0_4 = arith.constant 0 : index
    %12 = vector.load %arg0[%c0, %c0_3, %c0_4] : memref<8x2x16xf32, #tpu.memory_space<vmem>>, vector<8x2x16xf32>
    %13 = vector.extract_strided_slice %12 {offsets = [0, 0, 0], sizes = [1, 2, 16], strides = [1, 1, 1]} : vector<8x2x16xf32> to vector<1x2x16xf32>
    %14 = vector.shape_cast %13 : vector<1x2x16xf32> to vector<2x16xf32>
    %15 = vector.extract_strided_slice %12 {offsets = [1, 0, 0], sizes = [1, 2, 16], strides = [1, 1, 1]} : vector<8x2x16xf32> to vector<1x2x16xf32>
    %16 = vector.shape_cast %15 : vector<1x2x16xf32> to vector<2x16xf32>
    %17 = vector.extract_strided_slice %12 {offsets = [2, 0, 0], sizes = [1, 2, 16], strides = [1, 1, 1]} : vector<8x2x16xf32> to vector<1x2x16xf32>
    %18 = vector.shape_cast %17 : vector<1x2x16xf32> to vector<2x16xf32>
    %19 = vector.extract_strided_slice %12 {offsets = [3, 0, 0], sizes = [1, 2, 16], strides = [1, 1, 1]} : vector<8x2x16xf32> to vector<1x2x16xf32>
    %20 = vector.shape_cast %19 : vector<1x2x16xf32> to vector<2x16xf32>
    %21 = vector.extract_strided_slice %12 {offsets = [4, 0, 0], sizes = [1, 2, 16], strides = [1, 1, 1]} : vector<8x2x16xf32> to vector<1x2x16xf32>
    %22 = vector.shape_cast %21 : vector<1x2x16xf32> to vector<2x16xf32>
    %23 = vector.extract_strided_slice %12 {offsets = [5, 0, 0], sizes = [1, 2, 16], strides = [1, 1, 1]} : vector<8x2x16xf32> to vector<1x2x16xf32>
    %24 = vector.shape_cast %23 : vector<1x2x16xf32> to vector<2x16xf32>
    %25 = vector.extract_strided_slice %12 {offsets = [6, 0, 0], sizes = [1, 2, 16], strides = [1, 1, 1]} : vector<8x2x16xf32> to vector<1x2x16xf32>
    %26 = vector.shape_cast %25 : vector<1x2x16xf32> to vector<2x16xf32>
    %27 = vector.extract_strided_slice %12 {offsets = [7, 0, 0], sizes = [1, 2, 16], strides = [1, 1, 1]} : vector<8x2x16xf32> to vector<1x2x16xf32>
    %28 = vector.shape_cast %27 : vector<1x2x16xf32> to vector<2x16xf32>
    %c0_5 = arith.constant 0 : index
    %c0_6 = arith.constant 0 : index
    %29 = vector.load %arg1[%c0_5, %c0_6] : memref<16x128xf32, #tpu.memory_space<vmem>>, vector<16x128xf32>
    %c0_7 = arith.constant 0 : index
    %c0_8 = arith.constant 0 : index
    %30 = vector.load %arg2[%c0_7, %c0_8] : memref<32x128xf32, #tpu.memory_space<vmem>>, vector<32x128xf32>
    %c0_9 = arith.constant 0 : index
    %c0_10 = arith.constant 0 : index
    %31 = vector.load %arg3[%c0_9, %c0_10] : memref<1x128xf32, #tpu.memory_space<vmem>>, vector<1x128xf32>
    %cst_11 = arith.constant 0.000000e+00 : f32
    %32 = vector.broadcast %cst_11 : f32 to vector<2x32xf32>
    %cst_12 = arith.constant 0.000000e+00 : f32
    %33 = vector.broadcast %cst_12 : f32 to vector<2x32xf32>
    %cst_13 = arith.constant dense<0.000000e+00> : vector<2x128xf32>
    %34 = tpu.matmul %14, %29, %cst_13 {dimension_numbers = #tpu.dot_dimension_numbers<[1], [0], [0], [1], [0, 0, 1, 1], [], []>} : vector<2x16xf32>, vector<16x128xf32>, vector<2x128xf32> -> vector<2x128xf32>
    %cst_14 = arith.constant dense<0.000000e+00> : vector<2x128xf32>
    %35 = tpu.matmul %32, %30, %cst_14 {dimension_numbers = #tpu.dot_dimension_numbers<[1], [0], [0], [1], [0, 0, 1, 1], [], []>} : vector<2x32xf32>, vector<32x128xf32>, vector<2x128xf32> -> vector<2x128xf32>
    %36 = arith.addf %34, %35 : vector<2x128xf32>
    %37 = vector.broadcast %31 : vector<1x128xf32> to vector<2x128xf32>
    %38 = arith.addf %36, %37 : vector<2x128xf32>
    %39 = vector.broadcast %8 : vector<1x128xf32> to vector<2x128xf32>
    %40 = arith.mulf %38, %39 : vector<2x128xf32>
    %41 = math.tanh %40 : vector<2x128xf32>
    %42 = vector.broadcast %8 : vector<1x128xf32> to vector<2x128xf32>
    %43 = arith.mulf %41, %42 : vector<2x128xf32>
    %44 = vector.broadcast %11 : vector<1x128xf32> to vector<2x128xf32>
    %45 = arith.addf %43, %44 : vector<2x128xf32>
    %46 = vector.extract_strided_slice %45 {offsets = [0, 0], sizes = [2, 32], strides = [1, 1]} : vector<2x128xf32> to vector<2x32xf32>
    %47 = vector.extract_strided_slice %45 {offsets = [0, 32], sizes = [2, 32], strides = [1, 1]} : vector<2x128xf32> to vector<2x32xf32>
    %48 = vector.extract_strided_slice %45 {offsets = [0, 64], sizes = [2, 32], strides = [1, 1]} : vector<2x128xf32> to vector<2x32xf32>
    %49 = vector.extract_strided_slice %45 {offsets = [0, 96], sizes = [2, 32], strides = [1, 1]} : vector<2x128xf32> to vector<2x32xf32>
    %50 = arith.mulf %47, %33 : vector<2x32xf32>
    %51 = arith.mulf %46, %48 : vector<2x32xf32>
    %52 = arith.addf %50, %51 : vector<2x32xf32>
    %53 = math.tanh %52 : vector<2x32xf32>
    %54 = arith.mulf %49, %53 : vector<2x32xf32>
    %cst_15 = arith.constant dense<0.000000e+00> : vector<2x128xf32>
    %55 = tpu.matmul %16, %29, %cst_15 {dimension_numbers = #tpu.dot_dimension_numbers<[1], [0], [0], [1], [0, 0, 1, 1], [], []>} : vector<2x16xf32>, vector<16x128xf32>, vector<2x128xf32> -> vector<2x128xf32>
    %cst_16 = arith.constant dense<0.000000e+00> : vector<2x128xf32>
    %56 = tpu.matmul %54, %30, %cst_16 {dimension_numbers = #tpu.dot_dimension_numbers<[1], [0], [0], [1], [0, 0, 1, 1], [], []>} : vector<2x32xf32>, vector<32x128xf32>, vector<2x128xf32> -> vector<2x128xf32>
    %57 = arith.addf %55, %56 : vector<2x128xf32>
    %58 = vector.broadcast %31 : vector<1x128xf32> to vector<2x128xf32>
    %59 = arith.addf %57, %58 : vector<2x128xf32>
    %60 = vector.broadcast %8 : vector<1x128xf32> to vector<2x128xf32>
    %61 = arith.mulf %59, %60 : vector<2x128xf32>
    %62 = math.tanh %61 : vector<2x128xf32>
    %63 = vector.broadcast %8 : vector<1x128xf32> to vector<2x128xf32>
    %64 = arith.mulf %62, %63 : vector<2x128xf32>
    %65 = vector.broadcast %11 : vector<1x128xf32> to vector<2x128xf32>
    %66 = arith.addf %64, %65 : vector<2x128xf32>
    %67 = vector.extract_strided_slice %66 {offsets = [0, 0], sizes = [2, 32], strides = [1, 1]} : vector<2x128xf32> to vector<2x32xf32>
    %68 = vector.extract_strided_slice %66 {offsets = [0, 32], sizes = [2, 32], strides = [1, 1]} : vector<2x128xf32> to vector<2x32xf32>
    %69 = vector.extract_strided_slice %66 {offsets = [0, 64], sizes = [2, 32], strides = [1, 1]} : vector<2x128xf32> to vector<2x32xf32>
    %70 = vector.extract_strided_slice %66 {offsets = [0, 96], sizes = [2, 32], strides = [1, 1]} : vector<2x128xf32> to vector<2x32xf32>
    %71 = arith.mulf %68, %52 : vector<2x32xf32>
    %72 = arith.mulf %67, %69 : vector<2x32xf32>
    %73 = arith.addf %71, %72 : vector<2x32xf32>
    %74 = math.tanh %73 : vector<2x32xf32>
    %75 = arith.mulf %70, %74 : vector<2x32xf32>
    %cst_17 = arith.constant dense<0.000000e+00> : vector<2x128xf32>
    %76 = tpu.matmul %18, %29, %cst_17 {dimension_numbers = #tpu.dot_dimension_numbers<[1], [0], [0], [1], [0, 0, 1, 1], [], []>} : vector<2x16xf32>, vector<16x128xf32>, vector<2x128xf32> -> vector<2x128xf32>
    %cst_18 = arith.constant dense<0.000000e+00> : vector<2x128xf32>
    %77 = tpu.matmul %75, %30, %cst_18 {dimension_numbers = #tpu.dot_dimension_numbers<[1], [0], [0], [1], [0, 0, 1, 1], [], []>} : vector<2x32xf32>, vector<32x128xf32>, vector<2x128xf32> -> vector<2x128xf32>
    %78 = arith.addf %76, %77 : vector<2x128xf32>
    %79 = vector.broadcast %31 : vector<1x128xf32> to vector<2x128xf32>
    %80 = arith.addf %78, %79 : vector<2x128xf32>
    %81 = vector.broadcast %8 : vector<1x128xf32> to vector<2x128xf32>
    %82 = arith.mulf %80, %81 : vector<2x128xf32>
    %83 = math.tanh %82 : vector<2x128xf32>
    %84 = vector.broadcast %8 : vector<1x128xf32> to vector<2x128xf32>
    %85 = arith.mulf %83, %84 : vector<2x128xf32>
    %86 = vector.broadcast %11 : vector<1x128xf32> to vector<2x128xf32>
    %87 = arith.addf %85, %86 : vector<2x128xf32>
    %88 = vector.extract_strided_slice %87 {offsets = [0, 0], sizes = [2, 32], strides = [1, 1]} : vector<2x128xf32> to vector<2x32xf32>
    %89 = vector.extract_strided_slice %87 {offsets = [0, 32], sizes = [2, 32], strides = [1, 1]} : vector<2x128xf32> to vector<2x32xf32>
    %90 = vector.extract_strided_slice %87 {offsets = [0, 64], sizes = [2, 32], strides = [1, 1]} : vector<2x128xf32> to vector<2x32xf32>
    %91 = vector.extract_strided_slice %87 {offsets = [0, 96], sizes = [2, 32], strides = [1, 1]} : vector<2x128xf32> to vector<2x32xf32>
    %92 = arith.mulf %89, %73 : vector<2x32xf32>
    %93 = arith.mulf %88, %90 : vector<2x32xf32>
    %94 = arith.addf %92, %93 : vector<2x32xf32>
    %95 = math.tanh %94 : vector<2x32xf32>
    %96 = arith.mulf %91, %95 : vector<2x32xf32>
    %cst_19 = arith.constant dense<0.000000e+00> : vector<2x128xf32>
    %97 = tpu.matmul %20, %29, %cst_19 {dimension_numbers = #tpu.dot_dimension_numbers<[1], [0], [0], [1], [0, 0, 1, 1], [], []>} : vector<2x16xf32>, vector<16x128xf32>, vector<2x128xf32> -> vector<2x128xf32>
    %cst_20 = arith.constant dense<0.000000e+00> : vector<2x128xf32>
    %98 = tpu.matmul %96, %30, %cst_20 {dimension_numbers = #tpu.dot_dimension_numbers<[1], [0], [0], [1], [0, 0, 1, 1], [], []>} : vector<2x32xf32>, vector<32x128xf32>, vector<2x128xf32> -> vector<2x128xf32>
    %99 = arith.addf %97, %98 : vector<2x128xf32>
    %100 = vector.broadcast %31 : vector<1x128xf32> to vector<2x128xf32>
    %101 = arith.addf %99, %100 : vector<2x128xf32>
    %102 = vector.broadcast %8 : vector<1x128xf32> to vector<2x128xf32>
    %103 = arith.mulf %101, %102 : vector<2x128xf32>
    %104 = math.tanh %103 : vector<2x128xf32>
    %105 = vector.broadcast %8 : vector<1x128xf32> to vector<2x128xf32>
    %106 = arith.mulf %104, %105 : vector<2x128xf32>
    %107 = vector.broadcast %11 : vector<1x128xf32> to vector<2x128xf32>
    %108 = arith.addf %106, %107 : vector<2x128xf32>
    %109 = vector.extract_strided_slice %108 {offsets = [0, 0], sizes = [2, 32], strides = [1, 1]} : vector<2x128xf32> to vector<2x32xf32>
    %110 = vector.extract_strided_slice %108 {offsets = [0, 32], sizes = [2, 32], strides = [1, 1]} : vector<2x128xf32> to vector<2x32xf32>
    %111 = vector.extract_strided_slice %108 {offsets = [0, 64], sizes = [2, 32], strides = [1, 1]} : vector<2x128xf32> to vector<2x32xf32>
    %112 = vector.extract_strided_slice %108 {offsets = [0, 96], sizes = [2, 32], strides = [1, 1]} : vector<2x128xf32> to vector<2x32xf32>
    %113 = arith.mulf %110, %94 : vector<2x32xf32>
    %114 = arith.mulf %109, %111 : vector<2x32xf32>
    %115 = arith.addf %113, %114 : vector<2x32xf32>
    %116 = math.tanh %115 : vector<2x32xf32>
    %117 = arith.mulf %112, %116 : vector<2x32xf32>
    %cst_21 = arith.constant dense<0.000000e+00> : vector<2x128xf32>
    %118 = tpu.matmul %22, %29, %cst_21 {dimension_numbers = #tpu.dot_dimension_numbers<[1], [0], [0], [1], [0, 0, 1, 1], [], []>} : vector<2x16xf32>, vector<16x128xf32>, vector<2x128xf32> -> vector<2x128xf32>
    %cst_22 = arith.constant dense<0.000000e+00> : vector<2x128xf32>
    %119 = tpu.matmul %117, %30, %cst_22 {dimension_numbers = #tpu.dot_dimension_numbers<[1], [0], [0], [1], [0, 0, 1, 1], [], []>} : vector<2x32xf32>, vector<32x128xf32>, vector<2x128xf32> -> vector<2x128xf32>
    %120 = arith.addf %118, %119 : vector<2x128xf32>
    %121 = vector.broadcast %31 : vector<1x128xf32> to vector<2x128xf32>
    %122 = arith.addf %120, %121 : vector<2x128xf32>
    %123 = vector.broadcast %8 : vector<1x128xf32> to vector<2x128xf32>
    %124 = arith.mulf %122, %123 : vector<2x128xf32>
    %125 = math.tanh %124 : vector<2x128xf32>
    %126 = vector.broadcast %8 : vector<1x128xf32> to vector<2x128xf32>
    %127 = arith.mulf %125, %126 : vector<2x128xf32>
    %128 = vector.broadcast %11 : vector<1x128xf32> to vector<2x128xf32>
    %129 = arith.addf %127, %128 : vector<2x128xf32>
    %130 = vector.extract_strided_slice %129 {offsets = [0, 0], sizes = [2, 32], strides = [1, 1]} : vector<2x128xf32> to vector<2x32xf32>
    %131 = vector.extract_strided_slice %129 {offsets = [0, 32], sizes = [2, 32], strides = [1, 1]} : vector<2x128xf32> to vector<2x32xf32>
    %132 = vector.extract_strided_slice %129 {offsets = [0, 64], sizes = [2, 32], strides = [1, 1]} : vector<2x128xf32> to vector<2x32xf32>
    %133 = vector.extract_strided_slice %129 {offsets = [0, 96], sizes = [2, 32], strides = [1, 1]} : vector<2x128xf32> to vector<2x32xf32>
    %134 = arith.mulf %131, %115 : vector<2x32xf32>
    %135 = arith.mulf %130, %132 : vector<2x32xf32>
    %136 = arith.addf %134, %135 : vector<2x32xf32>
    %137 = math.tanh %136 : vector<2x32xf32>
    %138 = arith.mulf %133, %137 : vector<2x32xf32>
    %cst_23 = arith.constant dense<0.000000e+00> : vector<2x128xf32>
    %139 = tpu.matmul %24, %29, %cst_23 {dimension_numbers = #tpu.dot_dimension_numbers<[1], [0], [0], [1], [0, 0, 1, 1], [], []>} : vector<2x16xf32>, vector<16x128xf32>, vector<2x128xf32> -> vector<2x128xf32>
    %cst_24 = arith.constant dense<0.000000e+00> : vector<2x128xf32>
    %140 = tpu.matmul %138, %30, %cst_24 {dimension_numbers = #tpu.dot_dimension_numbers<[1], [0], [0], [1], [0, 0, 1, 1], [], []>} : vector<2x32xf32>, vector<32x128xf32>, vector<2x128xf32> -> vector<2x128xf32>
    %141 = arith.addf %139, %140 : vector<2x128xf32>
    %142 = vector.broadcast %31 : vector<1x128xf32> to vector<2x128xf32>
    %143 = arith.addf %141, %142 : vector<2x128xf32>
    %144 = vector.broadcast %8 : vector<1x128xf32> to vector<2x128xf32>
    %145 = arith.mulf %143, %144 : vector<2x128xf32>
    %146 = math.tanh %145 : vector<2x128xf32>
    %147 = vector.broadcast %8 : vector<1x128xf32> to vector<2x128xf32>
    %148 = arith.mulf %146, %147 : vector<2x128xf32>
    %149 = vector.broadcast %11 : vector<1x128xf32> to vector<2x128xf32>
    %150 = arith.addf %148, %149 : vector<2x128xf32>
    %151 = vector.extract_strided_slice %150 {offsets = [0, 0], sizes = [2, 32], strides = [1, 1]} : vector<2x128xf32> to vector<2x32xf32>
    %152 = vector.extract_strided_slice %150 {offsets = [0, 32], sizes = [2, 32], strides = [1, 1]} : vector<2x128xf32> to vector<2x32xf32>
    %153 = vector.extract_strided_slice %150 {offsets = [0, 64], sizes = [2, 32], strides = [1, 1]} : vector<2x128xf32> to vector<2x32xf32>
    %154 = vector.extract_strided_slice %150 {offsets = [0, 96], sizes = [2, 32], strides = [1, 1]} : vector<2x128xf32> to vector<2x32xf32>
    %155 = arith.mulf %152, %136 : vector<2x32xf32>
    %156 = arith.mulf %151, %153 : vector<2x32xf32>
    %157 = arith.addf %155, %156 : vector<2x32xf32>
    %158 = math.tanh %157 : vector<2x32xf32>
    %159 = arith.mulf %154, %158 : vector<2x32xf32>
    %cst_25 = arith.constant dense<0.000000e+00> : vector<2x128xf32>
    %160 = tpu.matmul %26, %29, %cst_25 {dimension_numbers = #tpu.dot_dimension_numbers<[1], [0], [0], [1], [0, 0, 1, 1], [], []>} : vector<2x16xf32>, vector<16x128xf32>, vector<2x128xf32> -> vector<2x128xf32>
    %cst_26 = arith.constant dense<0.000000e+00> : vector<2x128xf32>
    %161 = tpu.matmul %159, %30, %cst_26 {dimension_numbers = #tpu.dot_dimension_numbers<[1], [0], [0], [1], [0, 0, 1, 1], [], []>} : vector<2x32xf32>, vector<32x128xf32>, vector<2x128xf32> -> vector<2x128xf32>
    %162 = arith.addf %160, %161 : vector<2x128xf32>
    %163 = vector.broadcast %31 : vector<1x128xf32> to vector<2x128xf32>
    %164 = arith.addf %162, %163 : vector<2x128xf32>
    %165 = vector.broadcast %8 : vector<1x128xf32> to vector<2x128xf32>
    %166 = arith.mulf %164, %165 : vector<2x128xf32>
    %167 = math.tanh %166 : vector<2x128xf32>
    %168 = vector.broadcast %8 : vector<1x128xf32> to vector<2x128xf32>
    %169 = arith.mulf %167, %168 : vector<2x128xf32>
    %170 = vector.broadcast %11 : vector<1x128xf32> to vector<2x128xf32>
    %171 = arith.addf %169, %170 : vector<2x128xf32>
    %172 = vector.extract_strided_slice %171 {offsets = [0, 0], sizes = [2, 32], strides = [1, 1]} : vector<2x128xf32> to vector<2x32xf32>
    %173 = vector.extract_strided_slice %171 {offsets = [0, 32], sizes = [2, 32], strides = [1, 1]} : vector<2x128xf32> to vector<2x32xf32>
    %174 = vector.extract_strided_slice %171 {offsets = [0, 64], sizes = [2, 32], strides = [1, 1]} : vector<2x128xf32> to vector<2x32xf32>
    %175 = vector.extract_strided_slice %171 {offsets = [0, 96], sizes = [2, 32], strides = [1, 1]} : vector<2x128xf32> to vector<2x32xf32>
    %176 = arith.mulf %173, %157 : vector<2x32xf32>
    %177 = arith.mulf %172, %174 : vector<2x32xf32>
    %178 = arith.addf %176, %177 : vector<2x32xf32>
    %179 = math.tanh %178 : vector<2x32xf32>
    %180 = arith.mulf %175, %179 : vector<2x32xf32>
    %cst_27 = arith.constant dense<0.000000e+00> : vector<2x128xf32>
    %181 = tpu.matmul %28, %29, %cst_27 {dimension_numbers = #tpu.dot_dimension_numbers<[1], [0], [0], [1], [0, 0, 1, 1], [], []>} : vector<2x16xf32>, vector<16x128xf32>, vector<2x128xf32> -> vector<2x128xf32>
    %cst_28 = arith.constant dense<0.000000e+00> : vector<2x128xf32>
    %182 = tpu.matmul %180, %30, %cst_28 {dimension_numbers = #tpu.dot_dimension_numbers<[1], [0], [0], [1], [0, 0, 1, 1], [], []>} : vector<2x32xf32>, vector<32x128xf32>, vector<2x128xf32> -> vector<2x128xf32>
    %183 = arith.addf %181, %182 : vector<2x128xf32>
    %184 = vector.broadcast %31 : vector<1x128xf32> to vector<2x128xf32>
    %185 = arith.addf %183, %184 : vector<2x128xf32>
    %186 = vector.broadcast %8 : vector<1x128xf32> to vector<2x128xf32>
    %187 = arith.mulf %185, %186 : vector<2x128xf32>
    %188 = math.tanh %187 : vector<2x128xf32>
    %189 = vector.broadcast %8 : vector<1x128xf32> to vector<2x128xf32>
    %190 = arith.mulf %188, %189 : vector<2x128xf32>
    %191 = vector.broadcast %11 : vector<1x128xf32> to vector<2x128xf32>
    %192 = arith.addf %190, %191 : vector<2x128xf32>
    %193 = vector.extract_strided_slice %192 {offsets = [0, 0], sizes = [2, 32], strides = [1, 1]} : vector<2x128xf32> to vector<2x32xf32>
    %194 = vector.extract_strided_slice %192 {offsets = [0, 32], sizes = [2, 32], strides = [1, 1]} : vector<2x128xf32> to vector<2x32xf32>
    %195 = vector.extract_strided_slice %192 {offsets = [0, 64], sizes = [2, 32], strides = [1, 1]} : vector<2x128xf32> to vector<2x32xf32>
    %196 = vector.extract_strided_slice %192 {offsets = [0, 96], sizes = [2, 32], strides = [1, 1]} : vector<2x128xf32> to vector<2x32xf32>
    %197 = arith.mulf %194, %178 : vector<2x32xf32>
    %198 = arith.mulf %193, %195 : vector<2x32xf32>
    %199 = arith.addf %197, %198 : vector<2x32xf32>
    %200 = math.tanh %199 : vector<2x32xf32>
    %201 = arith.mulf %196, %200 : vector<2x32xf32>
    %c0_29 = arith.constant 0 : index
    %c0_30 = arith.constant 0 : index
    %202 = vector.load %arg4[%c0_29, %c0_30] : memref<32x128xf32, #tpu.memory_space<vmem>>, vector<32x128xf32>
    %c0_31 = arith.constant 0 : index
    %c0_32 = arith.constant 0 : index
    %203 = vector.load %arg5[%c0_31, %c0_32] : memref<32x128xf32, #tpu.memory_space<vmem>>, vector<32x128xf32>
    %c0_33 = arith.constant 0 : index
    %c0_34 = arith.constant 0 : index
    %204 = vector.load %arg6[%c0_33, %c0_34] : memref<1x128xf32, #tpu.memory_space<vmem>>, vector<1x128xf32>
    %cst_35 = arith.constant 0.000000e+00 : f32
    %205 = vector.broadcast %cst_35 : f32 to vector<2x32xf32>
    %cst_36 = arith.constant 0.000000e+00 : f32
    %206 = vector.broadcast %cst_36 : f32 to vector<2x32xf32>
    %cst_37 = arith.constant dense<0.000000e+00> : vector<2x128xf32>
    %207 = tpu.matmul %54, %202, %cst_37 {dimension_numbers = #tpu.dot_dimension_numbers<[1], [0], [0], [1], [0, 0, 1, 1], [], []>} : vector<2x32xf32>, vector<32x128xf32>, vector<2x128xf32> -> vector<2x128xf32>
    %cst_38 = arith.constant dense<0.000000e+00> : vector<2x128xf32>
    %208 = tpu.matmul %205, %203, %cst_38 {dimension_numbers = #tpu.dot_dimension_numbers<[1], [0], [0], [1], [0, 0, 1, 1], [], []>} : vector<2x32xf32>, vector<32x128xf32>, vector<2x128xf32> -> vector<2x128xf32>
    %209 = arith.addf %207, %208 : vector<2x128xf32>
    %210 = vector.broadcast %204 : vector<1x128xf32> to vector<2x128xf32>
    %211 = arith.addf %209, %210 : vector<2x128xf32>
    %212 = vector.broadcast %8 : vector<1x128xf32> to vector<2x128xf32>
    %213 = arith.mulf %211, %212 : vector<2x128xf32>
    %214 = math.tanh %213 : vector<2x128xf32>
    %215 = vector.broadcast %8 : vector<1x128xf32> to vector<2x128xf32>
    %216 = arith.mulf %214, %215 : vector<2x128xf32>
    %217 = vector.broadcast %11 : vector<1x128xf32> to vector<2x128xf32>
    %218 = arith.addf %216, %217 : vector<2x128xf32>
    %219 = vector.extract_strided_slice %218 {offsets = [0, 0], sizes = [2, 32], strides = [1, 1]} : vector<2x128xf32> to vector<2x32xf32>
    %220 = vector.extract_strided_slice %218 {offsets = [0, 32], sizes = [2, 32], strides = [1, 1]} : vector<2x128xf32> to vector<2x32xf32>
    %221 = vector.extract_strided_slice %218 {offsets = [0, 64], sizes = [2, 32], strides = [1, 1]} : vector<2x128xf32> to vector<2x32xf32>
    %222 = vector.extract_strided_slice %218 {offsets = [0, 96], sizes = [2, 32], strides = [1, 1]} : vector<2x128xf32> to vector<2x32xf32>
    %223 = arith.mulf %220, %206 : vector<2x32xf32>
    %224 = arith.mulf %219, %221 : vector<2x32xf32>
    %225 = arith.addf %223, %224 : vector<2x32xf32>
    %226 = math.tanh %225 : vector<2x32xf32>
    %227 = arith.mulf %222, %226 : vector<2x32xf32>
    %cst_39 = arith.constant dense<0.000000e+00> : vector<2x128xf32>
    %228 = tpu.matmul %75, %202, %cst_39 {dimension_numbers = #tpu.dot_dimension_numbers<[1], [0], [0], [1], [0, 0, 1, 1], [], []>} : vector<2x32xf32>, vector<32x128xf32>, vector<2x128xf32> -> vector<2x128xf32>
    %cst_40 = arith.constant dense<0.000000e+00> : vector<2x128xf32>
    %229 = tpu.matmul %227, %203, %cst_40 {dimension_numbers = #tpu.dot_dimension_numbers<[1], [0], [0], [1], [0, 0, 1, 1], [], []>} : vector<2x32xf32>, vector<32x128xf32>, vector<2x128xf32> -> vector<2x128xf32>
    %230 = arith.addf %228, %229 : vector<2x128xf32>
    %231 = vector.broadcast %204 : vector<1x128xf32> to vector<2x128xf32>
    %232 = arith.addf %230, %231 : vector<2x128xf32>
    %233 = vector.broadcast %8 : vector<1x128xf32> to vector<2x128xf32>
    %234 = arith.mulf %232, %233 : vector<2x128xf32>
    %235 = math.tanh %234 : vector<2x128xf32>
    %236 = vector.broadcast %8 : vector<1x128xf32> to vector<2x128xf32>
    %237 = arith.mulf %235, %236 : vector<2x128xf32>
    %238 = vector.broadcast %11 : vector<1x128xf32> to vector<2x128xf32>
    %239 = arith.addf %237, %238 : vector<2x128xf32>
    %240 = vector.extract_strided_slice %239 {offsets = [0, 0], sizes = [2, 32], strides = [1, 1]} : vector<2x128xf32> to vector<2x32xf32>
    %241 = vector.extract_strided_slice %239 {offsets = [0, 32], sizes = [2, 32], strides = [1, 1]} : vector<2x128xf32> to vector<2x32xf32>
    %242 = vector.extract_strided_slice %239 {offsets = [0, 64], sizes = [2, 32], strides = [1, 1]} : vector<2x128xf32> to vector<2x32xf32>
    %243 = vector.extract_strided_slice %239 {offsets = [0, 96], sizes = [2, 32], strides = [1, 1]} : vector<2x128xf32> to vector<2x32xf32>
    %244 = arith.mulf %241, %225 : vector<2x32xf32>
    %245 = arith.mulf %240, %242 : vector<2x32xf32>
    %246 = arith.addf %244, %245 : vector<2x32xf32>
    %247 = math.tanh %246 : vector<2x32xf32>
    %248 = arith.mulf %243, %247 : vector<2x32xf32>
    %cst_41 = arith.constant dense<0.000000e+00> : vector<2x128xf32>
    %249 = tpu.matmul %96, %202, %cst_41 {dimension_numbers = #tpu.dot_dimension_numbers<[1], [0], [0], [1], [0, 0, 1, 1], [], []>} : vector<2x32xf32>, vector<32x128xf32>, vector<2x128xf32> -> vector<2x128xf32>
    %cst_42 = arith.constant dense<0.000000e+00> : vector<2x128xf32>
    %250 = tpu.matmul %248, %203, %cst_42 {dimension_numbers = #tpu.dot_dimension_numbers<[1], [0], [0], [1], [0, 0, 1, 1], [], []>} : vector<2x32xf32>, vector<32x128xf32>, vector<2x128xf32> -> vector<2x128xf32>
    %251 = arith.addf %249, %250 : vector<2x128xf32>
    %252 = vector.broadcast %204 : vector<1x128xf32> to vector<2x128xf32>
    %253 = arith.addf %251, %252 : vector<2x128xf32>
    %254 = vector.broadcast %8 : vector<1x128xf32> to vector<2x128xf32>
    %255 = arith.mulf %253, %254 : vector<2x128xf32>
    %256 = math.tanh %255 : vector<2x128xf32>
    %257 = vector.broadcast %8 : vector<1x128xf32> to vector<2x128xf32>
    %258 = arith.mulf %256, %257 : vector<2x128xf32>
    %259 = vector.broadcast %11 : vector<1x128xf32> to vector<2x128xf32>
    %260 = arith.addf %258, %259 : vector<2x128xf32>
    %261 = vector.extract_strided_slice %260 {offsets = [0, 0], sizes = [2, 32], strides = [1, 1]} : vector<2x128xf32> to vector<2x32xf32>
    %262 = vector.extract_strided_slice %260 {offsets = [0, 32], sizes = [2, 32], strides = [1, 1]} : vector<2x128xf32> to vector<2x32xf32>
    %263 = vector.extract_strided_slice %260 {offsets = [0, 64], sizes = [2, 32], strides = [1, 1]} : vector<2x128xf32> to vector<2x32xf32>
    %264 = vector.extract_strided_slice %260 {offsets = [0, 96], sizes = [2, 32], strides = [1, 1]} : vector<2x128xf32> to vector<2x32xf32>
    %265 = arith.mulf %262, %246 : vector<2x32xf32>
    %266 = arith.mulf %261, %263 : vector<2x32xf32>
    %267 = arith.addf %265, %266 : vector<2x32xf32>
    %268 = math.tanh %267 : vector<2x32xf32>
    %269 = arith.mulf %264, %268 : vector<2x32xf32>
    %cst_43 = arith.constant dense<0.000000e+00> : vector<2x128xf32>
    %270 = tpu.matmul %117, %202, %cst_43 {dimension_numbers = #tpu.dot_dimension_numbers<[1], [0], [0], [1], [0, 0, 1, 1], [], []>} : vector<2x32xf32>, vector<32x128xf32>, vector<2x128xf32> -> vector<2x128xf32>
    %cst_44 = arith.constant dense<0.000000e+00> : vector<2x128xf32>
    %271 = tpu.matmul %269, %203, %cst_44 {dimension_numbers = #tpu.dot_dimension_numbers<[1], [0], [0], [1], [0, 0, 1, 1], [], []>} : vector<2x32xf32>, vector<32x128xf32>, vector<2x128xf32> -> vector<2x128xf32>
    %272 = arith.addf %270, %271 : vector<2x128xf32>
    %273 = vector.broadcast %204 : vector<1x128xf32> to vector<2x128xf32>
    %274 = arith.addf %272, %273 : vector<2x128xf32>
    %275 = vector.broadcast %8 : vector<1x128xf32> to vector<2x128xf32>
    %276 = arith.mulf %274, %275 : vector<2x128xf32>
    %277 = math.tanh %276 : vector<2x128xf32>
    %278 = vector.broadcast %8 : vector<1x128xf32> to vector<2x128xf32>
    %279 = arith.mulf %277, %278 : vector<2x128xf32>
    %280 = vector.broadcast %11 : vector<1x128xf32> to vector<2x128xf32>
    %281 = arith.addf %279, %280 : vector<2x128xf32>
    %282 = vector.extract_strided_slice %281 {offsets = [0, 0], sizes = [2, 32], strides = [1, 1]} : vector<2x128xf32> to vector<2x32xf32>
    %283 = vector.extract_strided_slice %281 {offsets = [0, 32], sizes = [2, 32], strides = [1, 1]} : vector<2x128xf32> to vector<2x32xf32>
    %284 = vector.extract_strided_slice %281 {offsets = [0, 64], sizes = [2, 32], strides = [1, 1]} : vector<2x128xf32> to vector<2x32xf32>
    %285 = vector.extract_strided_slice %281 {offsets = [0, 96], sizes = [2, 32], strides = [1, 1]} : vector<2x128xf32> to vector<2x32xf32>
    %286 = arith.mulf %283, %267 : vector<2x32xf32>
    %287 = arith.mulf %282, %284 : vector<2x32xf32>
    %288 = arith.addf %286, %287 : vector<2x32xf32>
    %289 = math.tanh %288 : vector<2x32xf32>
    %290 = arith.mulf %285, %289 : vector<2x32xf32>
    %cst_45 = arith.constant dense<0.000000e+00> : vector<2x128xf32>
    %291 = tpu.matmul %138, %202, %cst_45 {dimension_numbers = #tpu.dot_dimension_numbers<[1], [0], [0], [1], [0, 0, 1, 1], [], []>} : vector<2x32xf32>, vector<32x128xf32>, vector<2x128xf32> -> vector<2x128xf32>
    %cst_46 = arith.constant dense<0.000000e+00> : vector<2x128xf32>
    %292 = tpu.matmul %290, %203, %cst_46 {dimension_numbers = #tpu.dot_dimension_numbers<[1], [0], [0], [1], [0, 0, 1, 1], [], []>} : vector<2x32xf32>, vector<32x128xf32>, vector<2x128xf32> -> vector<2x128xf32>
    %293 = arith.addf %291, %292 : vector<2x128xf32>
    %294 = vector.broadcast %204 : vector<1x128xf32> to vector<2x128xf32>
    %295 = arith.addf %293, %294 : vector<2x128xf32>
    %296 = vector.broadcast %8 : vector<1x128xf32> to vector<2x128xf32>
    %297 = arith.mulf %295, %296 : vector<2x128xf32>
    %298 = math.tanh %297 : vector<2x128xf32>
    %299 = vector.broadcast %8 : vector<1x128xf32> to vector<2x128xf32>
    %300 = arith.mulf %298, %299 : vector<2x128xf32>
    %301 = vector.broadcast %11 : vector<1x128xf32> to vector<2x128xf32>
    %302 = arith.addf %300, %301 : vector<2x128xf32>
    %303 = vector.extract_strided_slice %302 {offsets = [0, 0], sizes = [2, 32], strides = [1, 1]} : vector<2x128xf32> to vector<2x32xf32>
    %304 = vector.extract_strided_slice %302 {offsets = [0, 32], sizes = [2, 32], strides = [1, 1]} : vector<2x128xf32> to vector<2x32xf32>
    %305 = vector.extract_strided_slice %302 {offsets = [0, 64], sizes = [2, 32], strides = [1, 1]} : vector<2x128xf32> to vector<2x32xf32>
    %306 = vector.extract_strided_slice %302 {offsets = [0, 96], sizes = [2, 32], strides = [1, 1]} : vector<2x128xf32> to vector<2x32xf32>
    %307 = arith.mulf %304, %288 : vector<2x32xf32>
    %308 = arith.mulf %303, %305 : vector<2x32xf32>
    %309 = arith.addf %307, %308 : vector<2x32xf32>
    %310 = math.tanh %309 : vector<2x32xf32>
    %311 = arith.mulf %306, %310 : vector<2x32xf32>
    %cst_47 = arith.constant dense<0.000000e+00> : vector<2x128xf32>
    %312 = tpu.matmul %159, %202, %cst_47 {dimension_numbers = #tpu.dot_dimension_numbers<[1], [0], [0], [1], [0, 0, 1, 1], [], []>} : vector<2x32xf32>, vector<32x128xf32>, vector<2x128xf32> -> vector<2x128xf32>
    %cst_48 = arith.constant dense<0.000000e+00> : vector<2x128xf32>
    %313 = tpu.matmul %311, %203, %cst_48 {dimension_numbers = #tpu.dot_dimension_numbers<[1], [0], [0], [1], [0, 0, 1, 1], [], []>} : vector<2x32xf32>, vector<32x128xf32>, vector<2x128xf32> -> vector<2x128xf32>
    %314 = arith.addf %312, %313 : vector<2x128xf32>
    %315 = vector.broadcast %204 : vector<1x128xf32> to vector<2x128xf32>
    %316 = arith.addf %314, %315 : vector<2x128xf32>
    %317 = vector.broadcast %8 : vector<1x128xf32> to vector<2x128xf32>
    %318 = arith.mulf %316, %317 : vector<2x128xf32>
    %319 = math.tanh %318 : vector<2x128xf32>
    %320 = vector.broadcast %8 : vector<1x128xf32> to vector<2x128xf32>
    %321 = arith.mulf %319, %320 : vector<2x128xf32>
    %322 = vector.broadcast %11 : vector<1x128xf32> to vector<2x128xf32>
    %323 = arith.addf %321, %322 : vector<2x128xf32>
    %324 = vector.extract_strided_slice %323 {offsets = [0, 0], sizes = [2, 32], strides = [1, 1]} : vector<2x128xf32> to vector<2x32xf32>
    %325 = vector.extract_strided_slice %323 {offsets = [0, 32], sizes = [2, 32], strides = [1, 1]} : vector<2x128xf32> to vector<2x32xf32>
    %326 = vector.extract_strided_slice %323 {offsets = [0, 64], sizes = [2, 32], strides = [1, 1]} : vector<2x128xf32> to vector<2x32xf32>
    %327 = vector.extract_strided_slice %323 {offsets = [0, 96], sizes = [2, 32], strides = [1, 1]} : vector<2x128xf32> to vector<2x32xf32>
    %328 = arith.mulf %325, %309 : vector<2x32xf32>
    %329 = arith.mulf %324, %326 : vector<2x32xf32>
    %330 = arith.addf %328, %329 : vector<2x32xf32>
    %331 = math.tanh %330 : vector<2x32xf32>
    %332 = arith.mulf %327, %331 : vector<2x32xf32>
    %cst_49 = arith.constant dense<0.000000e+00> : vector<2x128xf32>
    %333 = tpu.matmul %180, %202, %cst_49 {dimension_numbers = #tpu.dot_dimension_numbers<[1], [0], [0], [1], [0, 0, 1, 1], [], []>} : vector<2x32xf32>, vector<32x128xf32>, vector<2x128xf32> -> vector<2x128xf32>
    %cst_50 = arith.constant dense<0.000000e+00> : vector<2x128xf32>
    %334 = tpu.matmul %332, %203, %cst_50 {dimension_numbers = #tpu.dot_dimension_numbers<[1], [0], [0], [1], [0, 0, 1, 1], [], []>} : vector<2x32xf32>, vector<32x128xf32>, vector<2x128xf32> -> vector<2x128xf32>
    %335 = arith.addf %333, %334 : vector<2x128xf32>
    %336 = vector.broadcast %204 : vector<1x128xf32> to vector<2x128xf32>
    %337 = arith.addf %335, %336 : vector<2x128xf32>
    %338 = vector.broadcast %8 : vector<1x128xf32> to vector<2x128xf32>
    %339 = arith.mulf %337, %338 : vector<2x128xf32>
    %340 = math.tanh %339 : vector<2x128xf32>
    %341 = vector.broadcast %8 : vector<1x128xf32> to vector<2x128xf32>
    %342 = arith.mulf %340, %341 : vector<2x128xf32>
    %343 = vector.broadcast %11 : vector<1x128xf32> to vector<2x128xf32>
    %344 = arith.addf %342, %343 : vector<2x128xf32>
    %345 = vector.extract_strided_slice %344 {offsets = [0, 0], sizes = [2, 32], strides = [1, 1]} : vector<2x128xf32> to vector<2x32xf32>
    %346 = vector.extract_strided_slice %344 {offsets = [0, 32], sizes = [2, 32], strides = [1, 1]} : vector<2x128xf32> to vector<2x32xf32>
    %347 = vector.extract_strided_slice %344 {offsets = [0, 64], sizes = [2, 32], strides = [1, 1]} : vector<2x128xf32> to vector<2x32xf32>
    %348 = vector.extract_strided_slice %344 {offsets = [0, 96], sizes = [2, 32], strides = [1, 1]} : vector<2x128xf32> to vector<2x32xf32>
    %349 = arith.mulf %346, %330 : vector<2x32xf32>
    %350 = arith.mulf %345, %347 : vector<2x32xf32>
    %351 = arith.addf %349, %350 : vector<2x32xf32>
    %352 = math.tanh %351 : vector<2x32xf32>
    %353 = arith.mulf %348, %352 : vector<2x32xf32>
    %cst_51 = arith.constant dense<0.000000e+00> : vector<2x128xf32>
    %354 = tpu.matmul %201, %202, %cst_51 {dimension_numbers = #tpu.dot_dimension_numbers<[1], [0], [0], [1], [0, 0, 1, 1], [], []>} : vector<2x32xf32>, vector<32x128xf32>, vector<2x128xf32> -> vector<2x128xf32>
    %cst_52 = arith.constant dense<0.000000e+00> : vector<2x128xf32>
    %355 = tpu.matmul %353, %203, %cst_52 {dimension_numbers = #tpu.dot_dimension_numbers<[1], [0], [0], [1], [0, 0, 1, 1], [], []>} : vector<2x32xf32>, vector<32x128xf32>, vector<2x128xf32> -> vector<2x128xf32>
    %356 = arith.addf %354, %355 : vector<2x128xf32>
    %357 = vector.broadcast %204 : vector<1x128xf32> to vector<2x128xf32>
    %358 = arith.addf %356, %357 : vector<2x128xf32>
    %359 = vector.broadcast %8 : vector<1x128xf32> to vector<2x128xf32>
    %360 = arith.mulf %358, %359 : vector<2x128xf32>
    %361 = math.tanh %360 : vector<2x128xf32>
    %362 = vector.broadcast %8 : vector<1x128xf32> to vector<2x128xf32>
    %363 = arith.mulf %361, %362 : vector<2x128xf32>
    %364 = vector.broadcast %11 : vector<1x128xf32> to vector<2x128xf32>
    %365 = arith.addf %363, %364 : vector<2x128xf32>
    %366 = vector.extract_strided_slice %365 {offsets = [0, 0], sizes = [2, 32], strides = [1, 1]} : vector<2x128xf32> to vector<2x32xf32>
    %367 = vector.extract_strided_slice %365 {offsets = [0, 32], sizes = [2, 32], strides = [1, 1]} : vector<2x128xf32> to vector<2x32xf32>
    %368 = vector.extract_strided_slice %365 {offsets = [0, 64], sizes = [2, 32], strides = [1, 1]} : vector<2x128xf32> to vector<2x32xf32>
    %369 = vector.extract_strided_slice %365 {offsets = [0, 96], sizes = [2, 32], strides = [1, 1]} : vector<2x128xf32> to vector<2x32xf32>
    %370 = arith.mulf %367, %351 : vector<2x32xf32>
    %371 = arith.mulf %366, %368 : vector<2x32xf32>
    %372 = arith.addf %370, %371 : vector<2x32xf32>
    %373 = math.tanh %372 : vector<2x32xf32>
    %374 = arith.mulf %369, %373 : vector<2x32xf32>
    %c0_53 = arith.constant 0 : index
    %c0_54 = arith.constant 0 : index
    %375 = vector.load %arg7[%c0_53, %c0_54] : memref<32x10xf32, #tpu.memory_space<vmem>>, vector<32x10xf32>
    %cst_55 = arith.constant dense<0.000000e+00> : vector<2x10xf32>
    %376 = tpu.matmul %374, %375, %cst_55 {dimension_numbers = #tpu.dot_dimension_numbers<[1], [0], [0], [1], [0, 0, 1, 1], [], []>} : vector<2x32xf32>, vector<32x10xf32>, vector<2x10xf32> -> vector<2x10xf32>
    %c0_56 = arith.constant 0 : index
    %c0_57 = arith.constant 0 : index
    %377 = vector.load %arg8[%c0_56, %c0_57] : memref<1x10xf32, #tpu.memory_space<vmem>>, vector<1x10xf32>
    %378 = vector.broadcast %377 : vector<1x10xf32> to vector<2x10xf32>
    %379 = arith.addf %376, %378 : vector<2x10xf32>
    %c0_58 = arith.constant 0 : index
    %c0_59 = arith.constant 0 : index
    %380 = vector.load %arg9[%c0_58, %c0_59] : memref<2x10xf32, #tpu.memory_space<vmem>>, vector<2x10xf32>
    tpu.vector_store %arg9[%c0_58, %c0_59], %379 {strides = array<i32>} : memref<2x10xf32, #tpu.memory_space<vmem>>, vector<2x10xf32>,
    return
  }
}

</mosaic_0001>

<bundles_post_ra>
// kernel: lstm_model_forward.1
= control target key start
LH: loop header
LB: loop body
LE: loop exit
PB: predicated region body
PF: predicated region fallthrough
CT: control target
= control target key end

     0   :  { %14 = vsyncpa [#allocation3], 0  ;;  %s4244_s0 = inlined_call_operand.vmem [shape: f32[8,2,16], index: 0, kind: input, shape index: {}]   ;;  %s4245_s1 = inlined_call_operand.vmem [shape: f32[16,128], index: 1, kind: input, shape index: {}]   ;;  %s4246_s2 = inlined_call_operand.vmem [shape: f32[32,128], index: 2, kind: input, shape index: {}]   ;;  %s4247_s3 = inlined_call_operand.vmem [shape: f32[1,128], index: 3, kind: input, shape index: {}]   ;;  %s4248_s4 = inlined_call_operand.vmem [shape: f32[32,128], index: 4, kind: input, shape index: {}]   ;;  %s4249_s5 = inlined_call_operand.hbm [shape: f32[32,128], index: 5, kind: input, shape index: {}]   ;;  %s4250_s6 = inlined_call_operand.vmem [shape: f32[1,128], index: 6, kind: input, shape index: {}]   ;;  %s4251_s7 = inlined_call_operand.vmem [shape: f32[32,10], index: 7, kind: input, shape index: {}]   ;;  %s4252_s8 = inlined_call_operand.hbm [shape: f32[1,10], index: 8, kind: input, shape index: {}]   ;;  %s4253_s9 = inlined_call_operand.hbm [shape: f32[2,10], index: 9, kind: output, shape index: {}]  }
   0x1   :  { %15 = vsyncpa [#allocation6], 0 }
   0x2   :  { %16 = vsyncpa [#allocation4], 0  ;;  %s3557_s30 = smov [#allocation2]  }
   0x3   :  { %s32_s10 = sshll.u32 %s3557_s30, 4  ;;  %s33_s10 = int_to_ptr.vmem [resolvable:$true] %s32_s10 }
   0x4   :  { %s3499_s11 = scalar_lea.vmem %s33_s10, 512  ;;  %p3504_p1 = scmp.lt.s32.totalorder %s33_s10, %s33_s10 }
   0x5   :  { %p3500_p0 = scmp.ne.s32.totalorder %s33_s10, %s3499_s11  ;;  %p3505_p2 = scmp.lt.s32.totalorder %s3499_s11, %s3499_s11 }
   0x7   :  { %p3506_p3 = por %p3505_p2, %p3504_p1 }
   0x9   :  { %p3507_p4 = pnand %p3506_p3, %p3500_p0 }
   0xb   :  { %3510 = shalt.err (!%p3507_p4)
}
   0xc   :  { %s3558_s12 = smov 128   ;;  %s3559_s13 = smov 8  }
   0xd   :  { %38 = dma.hbm_to_vmem [thread:$0]  %s4249_s5, 512, %s33_s10, [#allocation3], %s3558_s12, %s3558_s12, %s3559_s13  }
   0xe   :  { %s3560_s16 = smov [#allocation5]  }
   0xf   :  { %s49_s17 = sshll.u32 %s3560_s16, 4  ;;  %s50_s17 = int_to_ptr.vmem [resolvable:$true] %s49_s17 }
  0x10   :  { %s3519_s18 = scalar_lea.vmem %s50_s17, 16  ;;  %s3523_s19 = scalar_lea.vmem %s50_s17, 32 }
  0x11   :  { %p3520_p5 = scmp.ne.s32.totalorder %s50_s17, %s3519_s18  ;;  %p3524_p6 = scmp.lt.s32.totalorder %s50_s17, %s50_s17 }
  0x12   :  { %p3525_p7 = scmp.lt.s32.totalorder %s3523_s19, %s3519_s18 }
  0x14   :  { %p3526_p8 = por %p3525_p7, %p3524_p6 }
  0x16   :  { %p3527_p9 = pnand %p3526_p8, %p3520_p5 }
  0x18   :  { %3530 = shalt.err (!%p3527_p9)
}
  0x19   :  { %52 = dma.hbm_to_vmem [thread:$0]  %s4252_s8, 16, %s50_s17, [#allocation6]  }
  0x1a   :  { %3551 = dma.done.wait [#allocation3], 512  }
  0x1b   :  { %3552 = vsyncadd [#allocation3], 4294966784 }
  0x1c   :  { %3553 = dma.done.wait [#allocation6], 16  }
  0x1d   :  { %3554 = vsyncadd [#allocation6], 4294967280  ;;  %v3561_v0 = vmov 0.0   ;;  %vm3562_vm0 = vmmov 0   ;;  %v3632_v1 = vld [vmem:[%s4246_s2 + $0x18] sm:$0xff]  ;;  %v3637_v2 = vld [vmem:[%s4246_s2 + $0x10] sm:$0xff]  ;;  %v59_v8 = vlaneseq }
  0x1e   :  { %3085 = vmatprep.subr.mxu0 %v3561_v0  ;;  %3096 = vmatprep.subr.mxu1 %v3561_v0  ;;  %v3642_v3 = vld [vmem:[%s4245_s1 + $0x8] sm:$0xff]  ;;  %v3649_v4 = vld [vmem:[%s4245_s1] sm:$0xff]  ;;  %vm155_vm1 = vcmask 130048   ;;  %v3563_v15 = vmov 0.5   ;;  %s3564_s13 = smov 64   ;;  %s3565_s14 = smov 32  }
  0x1f   :  { %3100 = vmatprep.mubr.msk.f32.mxu1 %vm3562_vm0, %v3561_v0  ;;  %3093 = vmatprep.mubr.msk.f32.mxu0 %vm3562_vm0, %v3561_v0  ;;  %v66_v5 = vld [vmem:[%s4244_s0] sm:$0x3]  ;;  %v3659_v6 = vld [vmem:[%s4246_s2 + $0x8] sm:$0xff]  ;;  %v60_v9 = vand.u32 127, %v59_v8  ;;  %vm81_vm5 = vcmask 261120   ;;  %s3566_s5 = smov [#allocation7]  }
  0x20   :  { %3086 = vmatpush3.msra.mxu0 %v3632_v1  ;;  %3097 = vmatpush3.msra.mxu1 %v3642_v3  ;;  %v3668_v7 = vld [vmem:[%s4246_s2] sm:$0xff]  ;;  %s2892_s22 = sshll.u32 %s3566_s5, 4  ;;  %vm2884_vm6 = vcmask 74752   ;;  %s2893_s22 = int_to_ptr.vmem [resolvable:$true] %s2892_s22 }
  0x21   :  { %3087 = vmatprep.subr.mxu0 %v3561_v0  ;;  %3098 = vmatprep.subr.mxu1 %v3561_v0  ;;  %vm61_vm2 = vcmp.ge.s32.totalorder %v60_v9, 64  ;;  %vm62_vm3 = vcmp.lt.s32.totalorder %v60_v9, 96  ;;  %v3699_v12 = vld [vmem:[%s4247_s3] ss:$0 sm:$0xff]  ;;  %v67_v33 = vld [vmem:[%s4244_s0 + $0x2] sm:$0x3]  ;;  %p3536_p11 = scmp.lt.s32.totalorder %s2893_s22, %s2893_s22 }
  0x22   :  { %3088 = vmatpush3.msra.mxu0 %v3637_v2  ;;  %3099 = vmatpush3.msra.mxu1 %v3649_v4  ;;  %vm63_vm4 = vmand %vm61_vm2, %vm62_vm3  ;;  %v68_v49 = vld [vmem:[%s4244_s0 + $0x4] sm:$0x3] }
  0x23   :  { %3089 = vmatprep.subr.mxu0 %v3561_v0  ;;  %3101 = vmatmul.mubr.msk.f32.vlgmr.msra.gmra.mxu1 %vm155_vm1, %v66_v5  ;;  %v3701_v16 = vsel %vm63_vm4, 1.0, %v3563_v15  ;;  %v3705_v21 = vsel %vm63_vm4, 0.0, %v3563_v15 }
  0x24   :  { %3090 = vmatpush3.msra.mxu0 %v3659_v6  ;;  %3103 = vmatprep.subr.mxu1 %v3561_v0 }
  0x25   :  { %3091 = vmatprep.subr.mxu0 %v3561_v0  ;;  %3104 = vmatpush3.msra.mxu1 %v3632_v1 }
  0x26   :  { %3092 = vmatpush3.msra.mxu0 %v3668_v7  ;;  %3105 = vmatprep.subr.mxu1 %v3561_v0 }
  0x27   :  { %3094 = vmatmul.mubr.f32.vlgmr.msra.gmra.mxu0 %v3561_v0  ;;  %3106 = vmatpush3.msra.mxu1 %v3637_v2 }
  0x28   :  { %3107 = vmatprep.subr.mxu1 %v3561_v0  ;;  %3111 = vmatprep.mubr.msk.f32.mxu1 %vm3562_vm0, %v3561_v0 }
  0x29   :  { %3108 = vmatpush3.msra.mxu1 %v3659_v6  ;;  %3121 = vmatprep.subr.mxu0 %v3561_v0 }
  0x2a   :  { %3109 = vmatprep.subr.mxu1 %v3561_v0  ;;  %3122 = vmatpush3.msra.mxu0 %v3632_v1 }
  0x2b   :  { %3110 = vmatpush3.msra.mxu1 %v3668_v7  ;;  %3123 = vmatprep.subr.mxu0 %v3561_v0 }
  0x2c   :  { %3114 = vmatprep.subr.mxu1 %v3561_v0  ;;  %3124 = vmatpush3.msra.mxu0 %v3637_v2 }
  0x2d   :  { %3125 = vmatprep.subr.mxu0 %v3561_v0  ;;  %3129 = vmatprep.mubr.msk.f32.mxu0 %vm3562_vm0, %v3561_v0 }
  0x2e   :  { %3126 = vmatpush3.msra.mxu0 %v3659_v6 }
  0x2f   :  { %3127 = vmatprep.subr.mxu0 %v3561_v0 }
  0x30   :  { %3128 = vmatpush3.msra.mxu0 %v3668_v7 }
  0x31   :  { %3150 = vmatprep.subr.mxu0 %v3561_v0 }
  0xe3   :  { %v225_v10 = vpop.f32.mrf.mxu1 }
  0xe5   :  { %v3102_v11 = vpop.f32.mrf.mxu1 }
  0xe7   :  { %v151_v13 = vpop.f32.mrf.mxu0 }
  0xe8   :  { %v226_v14 = vadd.f32 %v225_v10, %v151_v13  ;;  %v69_v13 = vld [vmem:[%s4244_s0 + $0x6] sm:$0x3] }
  0xe9   :  { %v3095_v17 = vpop.f32.mrf.mxu0 }
  0xea   :  { %v235_v18 = vadd.f32 %v3699_v12, %v226_v14 }
  0xec   :  { %v236_v19 = vmul.f32 %v235_v18, %v3701_v16 }
  0xee   :  { %3426 = vtanh.f32 %v236_v19 }
  0xfb   :  { %v3427_v20 = vpop.eup %3426 }
  0xfc   :  { %v238_v22 = vmul.f32 %v3427_v20, %v3701_v16 }
  0xfe   :  { %v239_v23 = vadd.f32 %v238_v22, %v3705_v21 }
 0x100   :  { %242 = vrot.lane.b32.xlu0 %v239_v23, %s3564_s13  ;;  %v240_v26 = vmul.f32 0.0, %v239_v23 }
 0x172   :  { %v243_v24 = vpop.permute.xlu0 %242 }
 0x173   :  { %v245_v25 = vmul.f32 %v243_v24, %v239_v23 }
 0x175   :  { %247 = vrot.lane.b32.xlu0 %v245_v25, %s3565_s14 }
 0x1e7   :  { %v248_v27 = vpop.permute.xlu0 %247 }
 0x1e8   :  { %v250_v28 = vadd.f32 %v248_v27, %v240_v26 }
 0x1ea   :  { %3428 = vtanh.f32 %v250_v28 }
 0x1f7   :  { %v3429_v29 = vpop.eup %3428 }
 0x1f8   :  { %253 = vrot.lane.b32.xlu1 %v3429_v29, %s3564_s13 }
 0x26a   :  { %v254_v30 = vpop.permute.xlu1 %253 }
 0x26b   :  { %v256_v31 = vmul.f32 %v254_v30, %v239_v23 }
 0x26d   :  { %258 = vrot.lane.b32.xlu1 %v256_v31, %s3565_s14 }
 0x2df   :  { %v3713_v32 = vpop.permute.xlu1 %258 }
 0x2e0   :  { %3112 = vmatmul.mubr.msk.f32.vlgmr.msra.gmra.mxu1 %vm81_vm5, %v3713_v32 }
 0x2e1   :  { %3115 = vmatpush3.msra.mxu1 %v3642_v3  ;;  %3118 = vmatprep.mubr.msk.f32.mxu1 %vm3562_vm0, %v3561_v0 }
 0x2e2   :  { %3116 = vmatprep.subr.mxu1 %v3561_v0 }
 0x2e3   :  { %3117 = vmatpush3.msra.mxu1 %v3649_v4 }
 0x2e4   :  { %3119 = vmatmul.mubr.msk.f32.vlgmr.msra.gmra.mxu1 %vm155_vm1, %v67_v33  ;;  %3132 = vmatprep.subr.mxu1 %v3561_v0 }
 0x2e5   :  { %3133 = vmatpush3.msra.mxu1 %v3642_v3  ;;  %3136 = vmatprep.mubr.msk.f32.mxu1 %vm3562_vm0, %v3561_v0 }
 0x2e6   :  { %3134 = vmatprep.subr.mxu1 %v3561_v0 }
 0x2e7   :  { %3135 = vmatpush3.msra.mxu1 %v3649_v4 }
 0x2e8   :  { %3139 = vmatprep.subr.mxu1 %v3561_v0  ;;  %3137 = vmatmul.mubr.msk.f32.vlgmr.msra.gmra.mxu1 %vm155_vm1, %v68_v49 }
 0x2e9   :  { %3140 = vmatpush3.msra.mxu1 %v3632_v1  ;;  %3147 = vmatprep.mubr.msk.f32.mxu1 %vm3562_vm0, %v3561_v0 }
 0x2ea   :  { %3141 = vmatprep.subr.mxu1 %v3561_v0 }
 0x2eb   :  { %3142 = vmatpush3.msra.mxu1 %v3637_v2 }
 0x2ec   :  { %3143 = vmatprep.subr.mxu1 %v3561_v0 }
 0x2ed   :  { %3144 = vmatpush3.msra.mxu1 %v3659_v6 }
 0x2ee   :  { %3145 = vmatprep.subr.mxu1 %v3561_v0 }
 0x2ef   :  { %3146 = vmatpush3.msra.mxu1 %v3668_v7 }
 0x2f0   :  { %3168 = vmatprep.subr.mxu1 %v3561_v0 }
 0x3a0   :  { %v328_v34 = vpop.f32.mrf.mxu1 }
 0x3a2   :  { %v3113_v35 = vpop.f32.mrf.mxu1 }
 0x3a4   :  { %v401_v36 = vpop.f32.mrf.mxu1 }
 0x3a5   :  { %v402_v37 = vadd.f32 %v401_v36, %v328_v34  ;;  %v70_v36 = vld [vmem:[%s4244_s0 + $0x8] sm:$0x3] }
 0x3a6   :  { %v3120_v38 = vpop.f32.mrf.mxu1 }
 0x3a7   :  { %v405_v39 = vadd.f32 %v3699_v12, %v402_v37 }
 0x3a8   :  { %v571_v53 = vpop.f32.mrf.mxu1 }
 0x3a9   :  { %v406_v40 = vmul.f32 %v405_v39, %v3701_v16 }
 0x3aa   :  { %v3138_v54 = vpop.f32.mrf.mxu1 }
 0x3ab   :  { %3430 = vtanh.f32 %v406_v40 }
 0x3b8   :  { %v3431_v41 = vpop.eup %3430 }
 0x3b9   :  { %v408_v42 = vmul.f32 %v3431_v41, %v3701_v16 }
 0x3bb   :  { %v409_v43 = vadd.f32 %v408_v42, %v3705_v21 }
 0x3bd   :  { %412 = vrot.lane.b32.xlu0 %v409_v43, %s3564_s13  ;;  %v410_v46 = vmul.f32 %v409_v43, %v250_v28 }
 0x42f   :  { %v413_v44 = vpop.permute.xlu0 %412 }
 0x430   :  { %v415_v45 = vmul.f32 %v413_v44, %v409_v43 }
 0x432   :  { %417 = vrot.lane.b32.xlu1 %v415_v45, %s3565_s14 }
 0x4a4   :  { %v418_v47 = vpop.permute.xlu1 %417 }
 0x4a5   :  { %v420_v48 = vadd.f32 %v418_v47, %v410_v46 }
 0x4a7   :  { %3432 = vtanh.f32 %v420_v48 }
 0x4b4   :  { %v3433_v50 = vpop.eup %3432 }
 0x4b5   :  { %423 = vrot.lane.b32.xlu0 %v3433_v50, %s3564_s13 }
 0x527   :  { %v424_v51 = vpop.permute.xlu0 %423 }
 0x528   :  { %v426_v52 = vmul.f32 %v424_v51, %v409_v43 }
 0x52a   :  { %428 = vrot.lane.b32.xlu1 %v426_v52, %s3565_s14 }
 0x59c   :  { %v3755_v55 = vpop.permute.xlu1 %428 }
 0x59d   :  { %3130 = vmatmul.mubr.msk.f32.vlgmr.msra.gmra.mxu0 %vm81_vm5, %v3755_v55 }
 0x59e   :  { %3151 = vmatpush3.msra.mxu0 %v3642_v3  ;;  %3154 = vmatprep.mubr.msk.f32.mxu0 %vm3562_vm0, %v3561_v0 }
 0x59f   :  { %3152 = vmatprep.subr.mxu0 %v3561_v0 }
 0x5a0   :  { %3153 = vmatpush3.msra.mxu0 %v3649_v4 }
 0x5a1   :  { %3157 = vmatprep.subr.mxu0 %v3561_v0  ;;  %3155 = vmatmul.mubr.msk.f32.vlgmr.msra.gmra.mxu0 %vm155_vm1, %v69_v13 }
 0x5a2   :  { %3158 = vmatpush3.msra.mxu0 %v3632_v1  ;;  %3165 = vmatprep.mubr.msk.f32.mxu0 %vm3562_vm0, %v3561_v0 }
 0x5a3   :  { %3159 = vmatprep.subr.mxu0 %v3561_v0 }
 0x5a4   :  { %3160 = vmatpush3.msra.mxu0 %v3637_v2 }
 0x5a5   :  { %3161 = vmatprep.subr.mxu0 %v3561_v0 }
 0x5a6   :  { %3162 = vmatpush3.msra.mxu0 %v3659_v6 }
 0x5a7   :  { %3163 = vmatprep.subr.mxu0 %v3561_v0 }
 0x5a8   :  { %3164 = vmatpush3.msra.mxu0 %v3668_v7 }
 0x5a9   :  { %3186 = vmatprep.subr.mxu0 %v3561_v0 }
 0x65d   :  { %v498_v56 = vpop.f32.mrf.mxu0 }
 0x65e   :  { %v572_v57 = vadd.f32 %v571_v53, %v498_v56 }
 0x65f   :  { %v3131_v58 = vpop.f32.mrf.mxu0 }
 0x660   :  { %v575_v59 = vadd.f32 %v3699_v12, %v572_v57  ;;  %v71_v57 = vld [vmem:[%s4244_s0 + $0xa] sm:$0x3] }
 0x661   :  { %v741_v18 = vpop.f32.mrf.mxu0 }
 0x662   :  { %v576_v60 = vmul.f32 %v575_v59, %v3701_v16 }
 0x663   :  { %v3156_v19 = vpop.f32.mrf.mxu0 }
 0x664   :  { %3434 = vtanh.f32 %v576_v60 }
 0x671   :  { %v3435_v61 = vpop.eup %3434 }
 0x672   :  { %v578_v62 = vmul.f32 %v3435_v61, %v3701_v16 }
 0x674   :  { %v579_v63 = vadd.f32 %v578_v62, %v3705_v21 }
 0x676   :  { %582 = vrot.lane.b32.xlu0 %v579_v63, %s3564_s13  ;;  %v580_v9 = vmul.f32 %v579_v63, %v420_v48 }
 0x6e8   :  { %v583_v5 = vpop.permute.xlu0 %582 }
 0x6e9   :  { %v585_v8 = vmul.f32 %v583_v5, %v579_v63 }
 0x6eb   :  { %587 = vrot.lane.b32.xlu1 %v585_v8, %s3565_s14 }
 0x75d   :  { %v588_v10 = vpop.permute.xlu1 %587 }
 0x75e   :  { %v590_v11 = vadd.f32 %v588_v10, %v580_v9 }
 0x760   :  { %3436 = vtanh.f32 %v590_v11 }
 0x76d   :  { %v3437_v14 = vpop.eup %3436 }
 0x76e   :  { %593 = vrot.lane.b32.xlu0 %v3437_v14, %s3564_s13 }
 0x7e0   :  { %v594_v15 = vpop.permute.xlu0 %593 }
 0x7e1   :  { %v596_v17 = vmul.f32 %v594_v15, %v579_v63 }
 0x7e3   :  { %598 = vrot.lane.b32.xlu1 %v596_v17, %s3565_s14 }
 0x855   :  { %v3787_v20 = vpop.permute.xlu1 %598 }
 0x856   :  { %3148 = vmatmul.mubr.msk.f32.vlgmr.msra.gmra.mxu1 %vm81_vm5, %v3787_v20 }
 0x857   :  { %3169 = vmatpush3.msra.mxu1 %v3642_v3  ;;  %3172 = vmatprep.mubr.msk.f32.mxu1 %vm3562_vm0, %v3561_v0 }
 0x858   :  { %3170 = vmatprep.subr.mxu1 %v3561_v0 }
 0x859   :  { %3171 = vmatpush3.msra.mxu1 %v3649_v4 }
 0x85a   :  { %3175 = vmatprep.subr.mxu1 %v3561_v0  ;;  %3173 = vmatmul.mubr.msk.f32.vlgmr.msra.gmra.mxu1 %vm155_vm1, %v70_v36 }
 0x85b   :  { %3176 = vmatpush3.msra.mxu1 %v3632_v1  ;;  %3183 = vmatprep.mubr.msk.f32.mxu1 %vm3562_vm0, %v3561_v0 }
 0x85c   :  { %3177 = vmatprep.subr.mxu1 %v3561_v0 }
 0x85d   :  { %3178 = vmatpush3.msra.mxu1 %v3637_v2 }
 0x85e   :  { %3179 = vmatprep.subr.mxu1 %v3561_v0 }
 0x85f   :  { %3180 = vmatpush3.msra.mxu1 %v3659_v6 }
 0x860   :  { %3181 = vmatprep.subr.mxu1 %v3561_v0 }
 0x861   :  { %3182 = vmatpush3.msra.mxu1 %v3668_v7 }
 0x862   :  { %3204 = vmatprep.subr.mxu1 %v3561_v0 }
 0x916   :  { %v668_v22 = vpop.f32.mrf.mxu1 }
 0x917   :  { %v742_v23 = vadd.f32 %v741_v18, %v668_v22 }
 0x918   :  { %v3149_v24 = vpop.f32.mrf.mxu1 }
 0x919   :  { %v745_v25 = vadd.f32 %v3699_v12, %v742_v23  ;;  %v72_v24 = vld [vmem:[%s4244_s0 + $0xc] sm:$0x3] }
 0x91a   :  { %v911_v40 = vpop.f32.mrf.mxu1 }
 0x91b   :  { %v746_v26 = vmul.f32 %v745_v25, %v3701_v16 }
 0x91c   :  { %v3174_v41 = vpop.f32.mrf.mxu1 }
 0x91d   :  { %3438 = vtanh.f32 %v746_v26  ;;  %v3913_v41 = vld [vmem:[#allocation2 + $0x10] sm:$0xff] }
 0x92a   :  { %v3439_v27 = vpop.eup %3438 }
 0x92b   :  { %v748_v28 = vmul.f32 %v3439_v27, %v3701_v16 }
 0x92d   :  { %v749_v29 = vadd.f32 %v748_v28, %v3705_v21 }
 0x92f   :  { %752 = vrot.lane.b32.xlu0 %v749_v29, %s3564_s13  ;;  %v750_v33 = vmul.f32 %v749_v29, %v590_v11 }
 0x9a1   :  { %v753_v30 = vpop.permute.xlu0 %752 }
 0x9a2   :  { %v755_v31 = vmul.f32 %v753_v30, %v749_v29 }
 0x9a4   :  { %757 = vrot.lane.b32.xlu1 %v755_v31, %s3565_s14 }
 0xa16   :  { %v758_v34 = vpop.permute.xlu1 %757 }
 0xa17   :  { %v760_v35 = vadd.f32 %v758_v34, %v750_v33 }
 0xa19   :  { %3440 = vtanh.f32 %v760_v35 }
 0xa26   :  { %v3441_v37 = vpop.eup %3440 }
 0xa27   :  { %763 = vrot.lane.b32.xlu0 %v3441_v37, %s3564_s13 }
 0xa99   :  { %v764_v38 = vpop.permute.xlu0 %763 }
 0xa9a   :  { %v766_v39 = vmul.f32 %v764_v38, %v749_v29 }
 0xa9c   :  { %768 = vrot.lane.b32.xlu1 %v766_v39, %s3565_s14  ;;  %v3905_v39 = vld [vmem:[#allocation2 + $0x18] sm:$0xff] }
 0xb0e   :  { %v3819_v42 = vpop.permute.xlu1 %768 }
 0xb0f   :  { %3166 = vmatmul.mubr.msk.f32.vlgmr.msra.gmra.mxu0 %vm81_vm5, %v3819_v42 }
 0xb10   :  { %3187 = vmatpush3.msra.mxu0 %v3642_v3  ;;  %3190 = vmatprep.mubr.msk.f32.mxu0 %vm3562_vm0, %v3561_v0 }
 0xb11   :  { %3188 = vmatprep.subr.mxu0 %v3561_v0 }
 0xb12   :  { %3189 = vmatpush3.msra.mxu0 %v3649_v4 }
 0xb13   :  { %3193 = vmatprep.subr.mxu0 %v3561_v0  ;;  %3191 = vmatmul.mubr.msk.f32.vlgmr.msra.gmra.mxu0 %vm155_vm1, %v71_v57 }
 0xb14   :  { %3194 = vmatpush3.msra.mxu0 %v3632_v1  ;;  %3201 = vmatprep.mubr.msk.f32.mxu0 %vm3562_vm0, %v3561_v0 }
 0xb15   :  { %3195 = vmatprep.subr.mxu0 %v3561_v0 }
 0xb16   :  { %3196 = vmatpush3.msra.mxu0 %v3637_v2 }
 0xb17   :  { %3197 = vmatprep.subr.mxu0 %v3561_v0 }
 0xb18   :  { %3198 = vmatpush3.msra.mxu0 %v3659_v6 }
 0xb19   :  { %3199 = vmatprep.subr.mxu0 %v3561_v0 }
 0xb1a   :  { %3200 = vmatpush3.msra.mxu0 %v3668_v7 }
 0xb1b   :  { %3222 = vmatprep.subr.mxu0 %v3561_v0 }
 0xbcf   :  { %v838_v43 = vpop.f32.mrf.mxu0 }
 0xbd0   :  { %v912_v44 = vadd.f32 %v911_v40, %v838_v43  ;;  %v3917_v43 = vld [vmem:[#allocation2 + $0x8] sm:$0xff] }
 0xbd1   :  { %v3167_v45 = vpop.f32.mrf.mxu0 }
 0xbd2   :  { %v915_v46 = vadd.f32 %v3699_v12, %v912_v44  ;;  %v3921_v44 = vld [vmem:[#allocation2] sm:$0xff] }
 0xbd3   :  { %v1081_v61 = vpop.f32.mrf.mxu0 }
 0xbd4   :  { %v916_v47 = vmul.f32 %v915_v46, %v3701_v16 }
 0xbd5   :  { %v3192_v62 = vpop.f32.mrf.mxu0 }
 0xbd6   :  { %3442 = vtanh.f32 %v916_v47 }
 0xbe3   :  { %v3443_v48 = vpop.eup %3442 }
 0xbe4   :  { %v918_v49 = vmul.f32 %v3443_v48, %v3701_v16 }
 0xbe6   :  { %v919_v50 = vadd.f32 %v918_v49, %v3705_v21  ;;  %v3942_v49 = vld [vmem:[%s4248_s4 + $0x18] sm:$0xff] }
 0xbe8   :  { %922 = vrot.lane.b32.xlu0 %v919_v50, %s3564_s13  ;;  %v920_v53 = vmul.f32 %v919_v50, %v760_v35 }
 0xc5a   :  { %v923_v51 = vpop.permute.xlu0 %922 }
 0xc5b   :  { %v925_v52 = vmul.f32 %v923_v51, %v919_v50  ;;  %v3951_v51 = vld [vmem:[%s4248_s4 + $0x10] sm:$0xff] }
 0xc5d   :  { %927 = vrot.lane.b32.xlu1 %v925_v52, %s3565_s14  ;;  %v3960_v52 = vld [vmem:[%s4248_s4 + $0x8] sm:$0xff] }
 0xccf   :  { %v928_v54 = vpop.permute.xlu1 %927 }
 0xcd0   :  { %v930_v56 = vadd.f32 %v928_v54, %v920_v53  ;;  %v3967_v53 = vld [vmem:[%s4248_s4] sm:$0xff] }
 0xcd1   :  { %v4061_v54 = vld [vmem:[%s4250_s6] ss:$0 sm:$0xff] }
 0xcd2   :  { %3444 = vtanh.f32 %v930_v56 }
 0xcdf   :  { %v3445_v58 = vpop.eup %3444 }
 0xce0   :  { %933 = vrot.lane.b32.xlu0 %v3445_v58, %s3564_s13 }
 0xd52   :  { %v934_v59 = vpop.permute.xlu0 %933 }
 0xd53   :  { %v936_v60 = vmul.f32 %v934_v59, %v919_v50 }
 0xd55   :  { %938 = vrot.lane.b32.xlu1 %v936_v60, %s3565_s14 }
 0xdc7   :  { %v3851_v63 = vpop.permute.xlu1 %938 }
 0xdc8   :  { %3184 = vmatmul.mubr.msk.f32.vlgmr.msra.gmra.mxu1 %vm81_vm5, %v3851_v63 }
 0xdc9   :  { %3205 = vmatpush3.msra.mxu1 %v3642_v3  ;;  %3208 = vmatprep.mubr.msk.f32.mxu1 %vm3562_vm0, %v3561_v0 }
 0xdca   :  { %3206 = vmatprep.subr.mxu1 %v3561_v0 }
 0xdcb   :  { %3207 = vmatpush3.msra.mxu1 %v3649_v4 }
 0xdcc   :  { %3211 = vmatprep.subr.mxu1 %v3561_v0  ;;  %3209 = vmatmul.mubr.msk.f32.vlgmr.msra.gmra.mxu1 %vm155_vm1, %v72_v24 }
 0xdcd   :  { %3212 = vmatpush3.msra.mxu1 %v3632_v1  ;;  %3219 = vmatprep.mubr.msk.f32.mxu1 %vm3562_vm0, %v3561_v0 }
 0xdce   :  { %3213 = vmatprep.subr.mxu1 %v3561_v0 }
 0xdcf   :  { %3214 = vmatpush3.msra.mxu1 %v3637_v2 }
 0xdd0   :  { %3215 = vmatprep.subr.mxu1 %v3561_v0 }
 0xdd1   :  { %3216 = vmatpush3.msra.mxu1 %v3659_v6 }
 0xdd2   :  { %3217 = vmatprep.subr.mxu1 %v3561_v0 }
 0xdd3   :  { %3218 = vmatpush3.msra.mxu1 %v3668_v7 }
 0xdd4   :  { %3240 = vmatprep.subr.mxu1 %v3561_v0 }
 0xe88   :  { %v1008_v5 = vpop.f32.mrf.mxu1 }
 0xe89   :  { %v1082_v8 = vadd.f32 %v1081_v61, %v1008_v5 }
 0xe8a   :  { %v3185_v9 = vpop.f32.mrf.mxu1 }
 0xe8b   :  { %v1085_v10 = vadd.f32 %v3699_v12, %v1082_v8 }
 0xe8c   :  { %v1251_v27 = vpop.f32.mrf.mxu1 }
 0xe8d   :  { %v1086_v11 = vmul.f32 %v1085_v10, %v3701_v16 }
 0xe8e   :  { %v3210_v28 = vpop.f32.mrf.mxu1 }
 0xe8f   :  { %3446 = vtanh.f32 %v1086_v11 }
 0xe9c   :  { %v3447_v13 = vpop.eup %3446 }
 0xe9d   :  { %v1088_v14 = vmul.f32 %v3447_v13, %v3701_v16 }
 0xe9f   :  { %v1089_v15 = vadd.f32 %v1088_v14, %v3705_v21 }
 0xea1   :  { %1092 = vrot.lane.b32.xlu0 %v1089_v15, %s3564_s13  ;;  %v1090_v19 = vmul.f32 %v1089_v15, %v930_v56 }
 0xf13   :  { %v1093_v17 = vpop.permute.xlu0 %1092 }
 0xf14   :  { %v1095_v18 = vmul.f32 %v1093_v17, %v1089_v15 }
 0xf16   :  { %1097 = vrot.lane.b32.xlu1 %v1095_v18, %s3565_s14 }
 0xf88   :  { %v1098_v22 = vpop.permute.xlu1 %1097 }
 0xf89   :  { %v1100_v23 = vadd.f32 %v1098_v22, %v1090_v19 }
 0xf8b   :  { %3448 = vtanh.f32 %v1100_v23 }
 0xf98   :  { %v3449_v25 = vpop.eup %3448 }
 0xf99   :  { %1103 = vrot.lane.b32.xlu0 %v3449_v25, %s3564_s13 }
0x100b   :  { %v1104_v1 = vpop.permute.xlu0 %1103 }
0x100c   :  { %v1106_v26 = vmul.f32 %v1104_v1, %v1089_v15 }
0x100e   :  { %1108 = vrot.lane.b32.xlu1 %v1106_v26, %s3565_s14 }
0x1080   :  { %v3883_v2 = vpop.permute.xlu1 %1108 }
0x1081   :  { %3202 = vmatmul.mubr.msk.f32.vlgmr.msra.gmra.mxu0 %vm81_vm5, %v3883_v2 }
0x1082   :  { %3223 = vmatpush3.msra.mxu0 %v3642_v3  ;;  %3226 = vmatprep.mubr.msk.f32.mxu0 %vm3562_vm0, %v3561_v0 }
0x1083   :  { %3224 = vmatprep.subr.mxu0 %v3561_v0 }
0x1084   :  { %3225 = vmatpush3.msra.mxu0 %v3649_v4 }
0x1085   :  { %3229 = vmatprep.subr.mxu0 %v3561_v0 }
0x1141   :  { %v1178_v6 = vpop.f32.mrf.mxu0 }
0x1142   :  { %v1252_v7 = vadd.f32 %v1251_v27, %v1178_v6 }
0x1143   :  { %v3203_v29 = vpop.f32.mrf.mxu0 }
0x1144   :  { %v1255_v30 = vadd.f32 %v3699_v12, %v1252_v7  ;;  %v73_v12 = vld [vmem:[%s4244_s0 + $0xe] sm:$0x3] }
0x1145   :  { %3227 = vmatmul.mubr.msk.f32.vlgmr.msra.gmra.mxu0 %vm155_vm1, %v73_v12 }
0x1146   :  { %v1256_v31 = vmul.f32 %v1255_v30, %v3701_v16  ;;  %3230 = vmatpush3.msra.mxu0 %v3905_v39  ;;  %3237 = vmatprep.mubr.msk.f32.mxu0 %vm3562_vm0, %v3561_v0 }
0x1147   :  { %3231 = vmatprep.subr.mxu0 %v3561_v0 }
0x1148   :  { %3450 = vtanh.f32 %v1256_v31  ;;  %3232 = vmatpush3.msra.mxu0 %v3913_v41 }
0x1149   :  { %3233 = vmatprep.subr.mxu0 %v3561_v0 }
0x114a   :  { %3234 = vmatpush3.msra.mxu0 %v3917_v43 }
0x114b   :  { %3235 = vmatprep.subr.mxu0 %v3561_v0 }
0x114c   :  { %3236 = vmatpush3.msra.mxu0 %v3921_v44 }
0x114d   :  { %3238 = vmatmul.mubr.f32.vlgmr.msra.gmra.mxu0 %v3561_v0  ;;  %3251 = vmatprep.subr.mxu0 %v3561_v0 }
0x114e   :  { %3252 = vmatpush3.msra.mxu0 %v3905_v39  ;;  %3259 = vmatprep.mubr.msk.f32.mxu0 %vm3562_vm0, %v3561_v0 }
0x114f   :  { %3253 = vmatprep.subr.mxu0 %v3561_v0 }
0x1150   :  { %3254 = vmatpush3.msra.mxu0 %v3913_v41 }
0x1151   :  { %3255 = vmatprep.subr.mxu0 %v3561_v0 }
0x1152   :  { %3256 = vmatpush3.msra.mxu0 %v3917_v43 }
0x1153   :  { %3257 = vmatprep.subr.mxu0 %v3561_v0 }
0x1154   :  { %3258 = vmatpush3.msra.mxu0 %v3921_v44 }
0x1155   :  { %v3451_v33 = vpop.eup %3450  ;;  %3273 = vmatprep.subr.mxu0 %v3561_v0 }
0x1156   :  { %v1258_v3 = vmul.f32 %v3451_v33, %v3701_v16 }
0x1158   :  { %v1259_v34 = vadd.f32 %v1258_v3, %v3705_v21 }
0x115a   :  { %1262 = vrot.lane.b32.xlu0 %v1259_v34, %s3564_s13  ;;  %v1260_v4 = vmul.f32 %v1259_v34, %v1100_v23 }
0x11cc   :  { %v1263_v35 = vpop.permute.xlu0 %1262 }
0x11cd   :  { %v1265_v36 = vmul.f32 %v1263_v35, %v1259_v34 }
0x11cf   :  { %1267 = vrot.lane.b32.xlu1 %v1265_v36, %s3565_s14 }
0x1205   :  { %v3937_v47 = vpop.f32.mrf.mxu0 }
0x1207   :  { %v3228_v48 = vpop.f32.mrf.mxu0 }
0x1241   :  { %v1268_v37 = vpop.permute.xlu1 %1267 }
0x1242   :  { %v3899_v38 = vadd.f32 %v1268_v37, %v1260_v4 }
0x1244   :  { %3452 = vtanh.f32 %v3899_v38 }
0x1251   :  { %v3453_v40 = vpop.eup %3452 }
0x1252   :  { %1273 = vrot.lane.b32.xlu0 %v3453_v40, %s3564_s13 }
0x12c4   :  { %v1274_v45 = vpop.permute.xlu0 %1273 }
0x12c5   :  { %v1276_v46 = vmul.f32 %v1274_v45, %v1259_v34 }
0x12c7   :  { %1278 = vrot.lane.b32.xlu1 %v1276_v46, %s3565_s14 }
0x1339   :  { %v3944_v50 = vpop.permute.xlu1 %1278 }
0x133a   :  { %3220 = vmatmul.mubr.msk.f32.vlgmr.msra.gmra.mxu1 %vm81_vm5, %v3944_v50 }
0x133b   :  { %3241 = vmatpush3.msra.mxu1 %v3942_v49  ;;  %3248 = vmatprep.mubr.msk.f32.mxu1 %vm3562_vm0, %v3561_v0 }
0x133c   :  { %3242 = vmatprep.subr.mxu1 %v3561_v0 }
0x133d   :  { %3243 = vmatpush3.msra.mxu1 %v3951_v51 }
0x133e   :  { %3244 = vmatprep.subr.mxu1 %v3561_v0 }
0x133f   :  { %3245 = vmatpush3.msra.mxu1 %v3960_v52 }
0x1340   :  { %3246 = vmatprep.subr.mxu1 %v3561_v0 }
0x1341   :  { %3247 = vmatpush3.msra.mxu1 %v3967_v53 }
0x1342   :  { %3249 = vmatmul.mubr.msk.f32.vlgmr.msra.gmra.mxu1 %vm81_vm5, %v3713_v32  ;;  %3262 = vmatprep.subr.mxu1 %v3561_v0  ;;  %v1522_v32 = vpop.f32.mrf.mxu0 }
0x1343   :  { %3263 = vmatpush3.msra.mxu1 %v3942_v49  ;;  %3270 = vmatprep.mubr.msk.f32.mxu1 %vm3562_vm0, %v3561_v0 }
0x1344   :  { %3264 = vmatprep.subr.mxu1 %v3561_v0 }
0x1345   :  { %3265 = vmatpush3.msra.mxu1 %v3951_v51 }
0x1346   :  { %3266 = vmatprep.subr.mxu1 %v3561_v0 }
0x1347   :  { %3267 = vmatpush3.msra.mxu1 %v3960_v52 }
0x1348   :  { %3268 = vmatprep.subr.mxu1 %v3561_v0 }
0x1349   :  { %3269 = vmatpush3.msra.mxu1 %v3967_v53 }
0x134a   :  { %3271 = vmatmul.mubr.msk.f32.vlgmr.msra.gmra.mxu1 %vm81_vm5, %v3755_v55  ;;  %3284 = vmatprep.subr.mxu1 %v3561_v0  ;;  %v3239_v55 = vpop.f32.mrf.mxu0 }
0x134b   :  { %3285 = vmatpush3.msra.mxu1 %v3942_v49  ;;  %3292 = vmatprep.mubr.msk.f32.mxu1 %vm3562_vm0, %v3561_v0 }
0x134c   :  { %3286 = vmatprep.subr.mxu1 %v3561_v0 }
0x134d   :  { %3287 = vmatpush3.msra.mxu1 %v3951_v51 }
0x134e   :  { %3288 = vmatprep.subr.mxu1 %v3561_v0 }
0x134f   :  { %3289 = vmatpush3.msra.mxu1 %v3960_v52 }
0x1350   :  { %3290 = vmatprep.subr.mxu1 %v3561_v0 }
0x1351   :  { %3291 = vmatpush3.msra.mxu1 %v3967_v53 }
0x1352   :  { %3293 = vmatmul.mubr.msk.f32.vlgmr.msra.gmra.mxu1 %vm81_vm5, %v3787_v20  ;;  %3306 = vmatprep.subr.mxu1 %v3561_v0 }
0x1353   :  { %3307 = vmatpush3.msra.mxu1 %v3942_v49  ;;  %3314 = vmatprep.mubr.msk.f32.mxu1 %vm3562_vm0, %v3561_v0 }
0x1354   :  { %3308 = vmatprep.subr.mxu1 %v3561_v0 }
0x1355   :  { %3309 = vmatpush3.msra.mxu1 %v3951_v51 }
0x1356   :  { %3310 = vmatprep.subr.mxu1 %v3561_v0 }
0x1357   :  { %3311 = vmatpush3.msra.mxu1 %v3960_v52 }
0x1358   :  { %3312 = vmatprep.subr.mxu1 %v3561_v0 }
0x1359   :  { %3313 = vmatpush3.msra.mxu1 %v3967_v53 }
0x135a   :  { %3315 = vmatmul.mubr.msk.f32.vlgmr.msra.gmra.mxu1 %vm81_vm5, %v3819_v42  ;;  %3328 = vmatprep.subr.mxu1 %v3561_v0 }
0x135b   :  { %3329 = vmatpush3.msra.mxu1 %v3942_v49  ;;  %3336 = vmatprep.mubr.msk.f32.mxu1 %vm3562_vm0, %v3561_v0 }
0x135c   :  { %3330 = vmatprep.subr.mxu1 %v3561_v0 }
0x135d   :  { %3331 = vmatpush3.msra.mxu1 %v3951_v51 }
0x135e   :  { %3332 = vmatprep.subr.mxu1 %v3561_v0 }
0x135f   :  { %3333 = vmatpush3.msra.mxu1 %v3960_v52 }
0x1360   :  { %3334 = vmatprep.subr.mxu1 %v3561_v0 }
0x1361   :  { %3335 = vmatpush3.msra.mxu1 %v3967_v53 }
0x1362   :  { %3337 = vmatmul.mubr.msk.f32.vlgmr.msra.gmra.mxu1 %vm81_vm5, %v3851_v63  ;;  %3350 = vmatprep.subr.mxu1 %v3561_v0 }
0x1363   :  { %3351 = vmatpush3.msra.mxu1 %v3942_v49  ;;  %3358 = vmatprep.mubr.msk.f32.mxu1 %vm3562_vm0, %v3561_v0 }
0x1364   :  { %3352 = vmatprep.subr.mxu1 %v3561_v0 }
0x1365   :  { %3353 = vmatpush3.msra.mxu1 %v3951_v51 }
0x1366   :  { %3354 = vmatprep.subr.mxu1 %v3561_v0 }
0x1367   :  { %3355 = vmatpush3.msra.mxu1 %v3960_v52 }
0x1368   :  { %3356 = vmatprep.subr.mxu1 %v3561_v0 }
0x1369   :  { %3357 = vmatpush3.msra.mxu1 %v3967_v53 }
0x136a   :  { %3359 = vmatmul.mubr.msk.f32.vlgmr.msra.gmra.mxu1 %vm81_vm5, %v3883_v2  ;;  %3372 = vmatprep.subr.mxu1 %v3561_v0 }
0x136b   :  { %3373 = vmatpush3.msra.mxu1 %v3942_v49  ;;  %3380 = vmatprep.mubr.msk.f32.mxu1 %vm3562_vm0, %v3561_v0 }
0x136c   :  { %3374 = vmatprep.subr.mxu1 %v3561_v0 }
0x136d   :  { %3375 = vmatpush3.msra.mxu1 %v3951_v51 }
0x136e   :  { %3376 = vmatprep.subr.mxu1 %v3561_v0 }
0x136f   :  { %3377 = vmatpush3.msra.mxu1 %v3960_v52 }
0x1370   :  { %3378 = vmatprep.subr.mxu1 %v3561_v0 }
0x1371   :  { %3379 = vmatpush3.msra.mxu1 %v3967_v53 }
0x1372   :  { %3381 = vmatmul.mubr.msk.f32.vlgmr.msra.gmra.mxu1 %vm81_vm5, %v3944_v50  ;;  %3394 = vmatprep.subr.mxu1 %v3561_v0 }
0x1373   :  { %3395 = vmatpush3.msra.mxu1 %v3942_v49  ;;  %3402 = vmatprep.mubr.msk.f32.mxu1 %vm3562_vm0, %v3561_v0 }
0x1374   :  { %3396 = vmatprep.subr.mxu1 %v3561_v0 }
0x1375   :  { %3397 = vmatpush3.msra.mxu1 %v3951_v51 }
0x1376   :  { %3398 = vmatprep.subr.mxu1 %v3561_v0 }
0x1377   :  { %3399 = vmatpush3.msra.mxu1 %v3960_v52 }
0x1378   :  { %3400 = vmatprep.subr.mxu1 %v3561_v0 }
0x1379   :  { %3401 = vmatpush3.msra.mxu1 %v3967_v53 }
0x13fa   :  { %v4056_v20 = vpop.f32.mrf.mxu1 }
0x13fc   :  { %v3221_v42 = vpop.f32.mrf.mxu1 }
0x1402   :  { %v1592_v56 = vpop.f32.mrf.mxu1 }
0x1403   :  { %v1593_v57 = vadd.f32 %v1592_v56, %v1522_v32 }
0x1404   :  { %v3250_v58 = vpop.f32.mrf.mxu1 }
0x1405   :  { %v1602_v59 = vadd.f32 %v4061_v54, %v1593_v57 }
0x1407   :  { %v1603_v60 = vmul.f32 %v1602_v59, %v3701_v16 }
0x1409   :  { %3454 = vtanh.f32 %v1603_v60 }
0x140a   :  { %v1765_v61 = vpop.f32.mrf.mxu1 }
0x140c   :  { %v3272_v62 = vpop.f32.mrf.mxu1 }
0x1412   :  { %v4065_v63 = vpop.f32.mrf.mxu1 }
0x1414   :  { %v3294_v5 = vpop.f32.mrf.mxu1 }
0x1416   :  { %v3455_v8 = vpop.eup %3454 }
0x1417   :  { %v1605_v9 = vmul.f32 %v3455_v8, %v3701_v16 }
0x1419   :  { %v1606_v10 = vadd.f32 %v1605_v9, %v3705_v21 }
0x141a   :  { %v4069_v11 = vpop.f32.mrf.mxu1 }
0x141b   :  { %1609 = vrot.lane.b32.xlu0 %v1606_v10, %s3564_s13  ;;  %v1607_v25 = vmul.f32 0.0, %v1606_v10 }
0x141c   :  { %v3316_v13 = vpop.f32.mrf.mxu1 }
0x1422   :  { %v4072_v14 = vpop.f32.mrf.mxu1 }
0x1424   :  { %v3338_v15 = vpop.f32.mrf.mxu1 }
0x142a   :  { %v4074_v17 = vpop.f32.mrf.mxu1 }
0x142c   :  { %v3360_v18 = vpop.f32.mrf.mxu1 }
0x1432   :  { %v4076_v19 = vpop.f32.mrf.mxu1 }
0x1434   :  { %v3382_v22 = vpop.f32.mrf.mxu1 }
0x148d   :  { %v1610_v23 = vpop.permute.xlu0 %1609 }
0x148e   :  { %v1612_v24 = vmul.f32 %v1610_v23, %v1606_v10 }
0x1490   :  { %1614 = vrot.lane.b32.xlu1 %v1612_v24, %s3565_s14 }
0x1502   :  { %v1615_v1 = vpop.permute.xlu1 %1614 }
0x1503   :  { %v1617_v26 = vadd.f32 %v1615_v1, %v1607_v25 }
0x1505   :  { %3456 = vtanh.f32 %v1617_v26 }
0x1512   :  { %v3457_v27 = vpop.eup %3456 }
0x1513   :  { %1620 = vrot.lane.b32.xlu0 %v3457_v27, %s3564_s13 }
0x1585   :  { %v1621_v28 = vpop.permute.xlu0 %1620 }
0x1586   :  { %v1623_v2 = vmul.f32 %v1621_v28, %v1606_v10 }
0x1588   :  { %1625 = vrot.lane.b32.xlu1 %v1623_v2, %s3565_s14 }
0x15fa   :  { %v1626_v6 = vpop.permute.xlu1 %1625 }
0x15fb   :  { %3260 = vmatmul.mubr.msk.f32.vlgmr.msra.gmra.mxu0 %vm81_vm5, %v1626_v6 }
0x15fc   :  { %3274 = vmatpush3.msra.mxu0 %v3905_v39  ;;  %3281 = vmatprep.mubr.msk.f32.mxu0 %vm3562_vm0, %v3561_v0 }
0x15fd   :  { %3275 = vmatprep.subr.mxu0 %v3561_v0 }
0x15fe   :  { %3276 = vmatpush3.msra.mxu0 %v3913_v41 }
0x15ff   :  { %3277 = vmatprep.subr.mxu0 %v3561_v0 }
0x1600   :  { %3278 = vmatpush3.msra.mxu0 %v3917_v43 }
0x1601   :  { %3279 = vmatprep.subr.mxu0 %v3561_v0 }
0x1602   :  { %3280 = vmatpush3.msra.mxu0 %v3921_v44 }
0x1603   :  { %3295 = vmatprep.subr.mxu0 %v3561_v0 }
0x16bb   :  { %v1695_v7 = vpop.f32.mrf.mxu0 }
0x16bc   :  { %v1766_v29 = vadd.f32 %v1765_v61, %v1695_v7 }
0x16bd   :  { %v3261_v30 = vpop.f32.mrf.mxu0 }
0x16be   :  { %v1769_v31 = vadd.f32 %v4061_v54, %v1766_v29 }
0x16c0   :  { %v1770_v33 = vmul.f32 %v1769_v31, %v3701_v16 }
0x16c2   :  { %3458 = vtanh.f32 %v1770_v33 }
0x16cf   :  { %v3459_v3 = vpop.eup %3458 }
0x16d0   :  { %v1772_v34 = vmul.f32 %v3459_v3, %v3701_v16 }
0x16d2   :  { %v1773_v35 = vadd.f32 %v1772_v34, %v3705_v21 }
0x16d4   :  { %1776 = vrot.lane.b32.xlu0 %v1773_v35, %s3564_s13  ;;  %v1774_v37 = vmul.f32 %v1773_v35, %v1617_v26 }
0x1746   :  { %v1777_v36 = vpop.permute.xlu0 %1776 }
0x1747   :  { %v1779_v4 = vmul.f32 %v1777_v36, %v1773_v35 }
0x1749   :  { %1781 = vrot.lane.b32.xlu1 %v1779_v4, %s3565_s14 }
0x17bb   :  { %v1782_v12 = vpop.permute.xlu1 %1781 }
0x17bc   :  { %v1784_v40 = vadd.f32 %v1782_v12, %v1774_v37 }
0x17be   :  { %3460 = vtanh.f32 %v1784_v40 }
0x17cb   :  { %v3461_v45 = vpop.eup %3460 }
0x17cc   :  { %1787 = vrot.lane.b32.xlu0 %v3461_v45, %s3564_s13 }
0x183e   :  { %v1788_v46 = vpop.permute.xlu0 %1787 }
0x183f   :  { %v1790_v48 = vmul.f32 %v1788_v46, %v1773_v35 }
0x1841   :  { %1792 = vrot.lane.b32.xlu1 %v1790_v48, %s3565_s14 }
0x18b3   :  { %v1793_v49 = vpop.permute.xlu1 %1792 }
0x18b4   :  { %3282 = vmatmul.mubr.msk.f32.vlgmr.msra.gmra.mxu0 %vm81_vm5, %v1793_v49 }
0x18b5   :  { %3296 = vmatpush3.msra.mxu0 %v3905_v39  ;;  %3303 = vmatprep.mubr.msk.f32.mxu0 %vm3562_vm0, %v3561_v0 }
0x18b6   :  { %3297 = vmatprep.subr.mxu0 %v3561_v0 }
0x18b7   :  { %3298 = vmatpush3.msra.mxu0 %v3913_v41 }
0x18b8   :  { %3299 = vmatprep.subr.mxu0 %v3561_v0 }
0x18b9   :  { %3300 = vmatpush3.msra.mxu0 %v3917_v43 }
0x18ba   :  { %3301 = vmatprep.subr.mxu0 %v3561_v0 }
0x18bb   :  { %3302 = vmatpush3.msra.mxu0 %v3921_v44 }
0x18bc   :  { %3317 = vmatprep.subr.mxu0 %v3561_v0 }
0x1974   :  { %v1862_v50 = vpop.f32.mrf.mxu0 }
0x1975   :  { %v1933_v51 = vadd.f32 %v4065_v63, %v1862_v50 }
0x1976   :  { %v3283_v52 = vpop.f32.mrf.mxu0 }
0x1977   :  { %v1936_v53 = vadd.f32 %v4061_v54, %v1933_v51 }
0x1979   :  { %v1937_v32 = vmul.f32 %v1936_v53, %v3701_v16 }
0x197b   :  { %3462 = vtanh.f32 %v1937_v32 }
0x1988   :  { %v3463_v55 = vpop.eup %3462 }
0x1989   :  { %v1939_v42 = vmul.f32 %v3463_v55, %v3701_v16 }
0x198b   :  { %v1940_v56 = vadd.f32 %v1939_v42, %v3705_v21 }
0x198d   :  { %1943 = vrot.lane.b32.xlu0 %v1940_v56, %s3564_s13  ;;  %v1941_v59 = vmul.f32 %v1940_v56, %v1784_v40 }
0x19ff   :  { %v1944_v57 = vpop.permute.xlu0 %1943 }
0x1a00   :  { %v1946_v58 = vmul.f32 %v1944_v57, %v1940_v56 }
0x1a02   :  { %1948 = vrot.lane.b32.xlu1 %v1946_v58, %s3565_s14 }
0x1a74   :  { %v1949_v60 = vpop.permute.xlu1 %1948 }
0x1a75   :  { %v1951_v61 = vadd.f32 %v1949_v60, %v1941_v59  ;;  %v3490_v59 = vld [vmem:[%s4247_s3] ss:$0 sm:$0xff] }
0x1a77   :  { %3464 = vtanh.f32 %v1951_v61 }
0x1a84   :  { %v3465_v62 = vpop.eup %3464 }
0x1a85   :  { %1954 = vrot.lane.b32.xlu0 %v3465_v62, %s3564_s13 }
0x1af7   :  { %v1955_v63 = vpop.permute.xlu0 %1954 }
0x1af8   :  { %v1957_v5 = vmul.f32 %v1955_v63, %v1940_v56 }
0x1afa   :  { %1959 = vrot.lane.b32.xlu1 %v1957_v5, %s3565_s14 }
0x1b6c   :  { %v1960_v8 = vpop.permute.xlu1 %1959 }
0x1b6d   :  { %3304 = vmatmul.mubr.msk.f32.vlgmr.msra.gmra.mxu0 %vm81_vm5, %v1960_v8 }
0x1b6e   :  { %3318 = vmatpush3.msra.mxu0 %v3905_v39  ;;  %3325 = vmatprep.mubr.msk.f32.mxu0 %vm3562_vm0, %v3561_v0 }
0x1b6f   :  { %3319 = vmatprep.subr.mxu0 %v3561_v0 }
0x1b70   :  { %3320 = vmatpush3.msra.mxu0 %v3913_v41 }
0x1b71   :  { %3321 = vmatprep.subr.mxu0 %v3561_v0 }
0x1b72   :  { %3322 = vmatpush3.msra.mxu0 %v3917_v43 }
0x1b73   :  { %3323 = vmatprep.subr.mxu0 %v3561_v0 }
0x1b74   :  { %3324 = vmatpush3.msra.mxu0 %v3921_v44 }
0x1b75   :  { %3339 = vmatprep.subr.mxu0 %v3561_v0 }
0x1c2d   :  { %v2029_v9 = vpop.f32.mrf.mxu0 }
0x1c2e   :  { %v2100_v10 = vadd.f32 %v4069_v11, %v2029_v9 }
0x1c2f   :  { %v3305_v13 = vpop.f32.mrf.mxu0 }
0x1c30   :  { %v2103_v15 = vadd.f32 %v4061_v54, %v2100_v10 }
0x1c32   :  { %v2104_v18 = vmul.f32 %v2103_v15, %v3701_v16 }
0x1c34   :  { %3466 = vtanh.f32 %v2104_v18 }
0x1c41   :  { %v3467_v22 = vpop.eup %3466 }
0x1c42   :  { %v2106_v23 = vmul.f32 %v3467_v22, %v3701_v16 }
0x1c44   :  { %v2107_v24 = vadd.f32 %v2106_v23, %v3705_v21 }
0x1c46   :  { %2110 = vrot.lane.b32.xlu0 %v2107_v24, %s3564_s13  ;;  %v2108_v26 = vmul.f32 %v2107_v24, %v1951_v61 }
0x1cb8   :  { %v2111_v25 = vpop.permute.xlu0 %2110 }
0x1cb9   :  { %v2113_v1 = vmul.f32 %v2111_v25, %v2107_v24 }
0x1cbb   :  { %2115 = vrot.lane.b32.xlu1 %v2113_v1, %s3565_s14 }
0x1d2d   :  { %v2116_v27 = vpop.permute.xlu1 %2115 }
0x1d2e   :  { %v2118_v11 = vadd.f32 %v2116_v27, %v2108_v26 }
0x1d30   :  { %3468 = vtanh.f32 %v2118_v11 }
0x1d3d   :  { %v3469_v28 = vpop.eup %3468 }
0x1d3e   :  { %2121 = vrot.lane.b32.xlu0 %v3469_v28, %s3564_s13 }
0x1db0   :  { %v2122_v2 = vpop.permute.xlu0 %2121 }
0x1db1   :  { %v2124_v6 = vmul.f32 %v2122_v2, %v2107_v24 }
0x1db3   :  { %2126 = vrot.lane.b32.xlu1 %v2124_v6, %s3565_s14 }
0x1e25   :  { %v2127_v7 = vpop.permute.xlu1 %2126 }
0x1e26   :  { %3326 = vmatmul.mubr.msk.f32.vlgmr.msra.gmra.mxu0 %vm81_vm5, %v2127_v7 }
0x1e27   :  { %3340 = vmatpush3.msra.mxu0 %v3905_v39  ;;  %3347 = vmatprep.mubr.msk.f32.mxu0 %vm3562_vm0, %v3561_v0 }
0x1e28   :  { %3341 = vmatprep.subr.mxu0 %v3561_v0 }
0x1e29   :  { %3342 = vmatpush3.msra.mxu0 %v3913_v41 }
0x1e2a   :  { %3343 = vmatprep.subr.mxu0 %v3561_v0 }
0x1e2b   :  { %3344 = vmatpush3.msra.mxu0 %v3917_v43 }
0x1e2c   :  { %3345 = vmatprep.subr.mxu0 %v3561_v0 }
0x1e2d   :  { %3346 = vmatpush3.msra.mxu0 %v3921_v44 }
0x1e2e   :  { %3361 = vmatprep.subr.mxu0 %v3561_v0 }
0x1ee6   :  { %v2196_v29 = vpop.f32.mrf.mxu0 }
0x1ee7   :  { %v2267_v30 = vadd.f32 %v4072_v14, %v2196_v29 }
0x1ee8   :  { %v3327_v31 = vpop.f32.mrf.mxu0 }
0x1ee9   :  { %v2270_v33 = vadd.f32 %v4061_v54, %v2267_v30 }
0x1eeb   :  { %v2271_v3 = vmul.f32 %v2270_v33, %v3701_v16 }
0x1eed   :  { %3470 = vtanh.f32 %v2271_v3 }
0x1efa   :  { %v3471_v34 = vpop.eup %3470 }
0x1efb   :  { %v2273_v35 = vmul.f32 %v3471_v34, %v3701_v16 }
0x1efd   :  { %v2274_v36 = vadd.f32 %v2273_v35, %v3705_v21 }
0x1eff   :  { %2277 = vrot.lane.b32.xlu0 %v2274_v36, %s3564_s13  ;;  %v2275_v12 = vmul.f32 %v2274_v36, %v2118_v11 }
0x1f71   :  { %v2278_v4 = vpop.permute.xlu0 %2277 }
0x1f72   :  { %v2280_v37 = vmul.f32 %v2278_v4, %v2274_v36 }
0x1f74   :  { %2282 = vrot.lane.b32.xlu1 %v2280_v37, %s3565_s14 }
0x1fe6   :  { %v2283_v40 = vpop.permute.xlu1 %2282 }
0x1fe7   :  { %v2285_v14 = vadd.f32 %v2283_v40, %v2275_v12 }
0x1fe9   :  { %3472 = vtanh.f32 %v2285_v14 }
0x1ff6   :  { %v3473_v45 = vpop.eup %3472 }
0x1ff7   :  { %2288 = vrot.lane.b32.xlu0 %v3473_v45, %s3564_s13 }
0x2069   :  { %v2289_v46 = vpop.permute.xlu0 %2288 }
0x206a   :  { %v2291_v48 = vmul.f32 %v2289_v46, %v2274_v36 }
0x206c   :  { %2293 = vrot.lane.b32.xlu1 %v2291_v48, %s3565_s14 }
0x20de   :  { %v2294_v49 = vpop.permute.xlu1 %2293 }
0x20df   :  { %3348 = vmatmul.mubr.msk.f32.vlgmr.msra.gmra.mxu0 %vm81_vm5, %v2294_v49 }
0x20e0   :  { %3362 = vmatpush3.msra.mxu0 %v3905_v39  ;;  %3369 = vmatprep.mubr.msk.f32.mxu0 %vm3562_vm0, %v3561_v0 }
0x20e1   :  { %3363 = vmatprep.subr.mxu0 %v3561_v0 }
0x20e2   :  { %3364 = vmatpush3.msra.mxu0 %v3913_v41 }
0x20e3   :  { %3365 = vmatprep.subr.mxu0 %v3561_v0 }
0x20e4   :  { %3366 = vmatpush3.msra.mxu0 %v3917_v43 }
0x20e5   :  { %3367 = vmatprep.subr.mxu0 %v3561_v0 }
0x20e6   :  { %3368 = vmatpush3.msra.mxu0 %v3921_v44 }
0x20e7   :  { %3383 = vmatprep.subr.mxu0 %v3561_v0 }
0x219f   :  { %v2363_v50 = vpop.f32.mrf.mxu0 }
0x21a0   :  { %v2434_v51 = vadd.f32 %v4074_v17, %v2363_v50  ;;  %v1422_v17 = vadd.f32 %v3937_v47, %v4056_v20 }
0x21a1   :  { %v3349_v52 = vpop.f32.mrf.mxu0 }
0x21a2   :  { %v2437_v53 = vadd.f32 %v4061_v54, %v2434_v51  ;;  %v1425_v60 = vadd.f32 %v3490_v59, %v1422_v17  ;;  %v2934_v17 = vld [vmem:[#allocation5] ss:$0 sm:$0xff] }
0x21a4   :  { %v2438_v32 = vmul.f32 %v2437_v53, %v3701_v16  ;;  %v1426_v61 = vmul.f32 %v1425_v60, %v3701_v16 }
0x21a6   :  { %3474 = vtanh.f32 %v2438_v32 }
0x21a7   :  { %3476 = vtanh.f32 %v1426_v61 }
0x21b3   :  { %v3475_v55 = vpop.eup %3474 }
0x21b4   :  { %v2440_v42 = vmul.f32 %v3475_v55, %v3701_v16  ;;  %v3477_v8 = vpop.eup %3476  ;;  %v2798_v55 = vld [vmem:[%s4251_s7] sm:$0xff] }
0x21b5   :  { %v1428_v9 = vmul.f32 %v3477_v8, %v3701_v16 }
0x21b6   :  { %v2441_v56 = vadd.f32 %v2440_v42, %v3705_v21 }
0x21b7   :  { %v1429_v47 = vadd.f32 %v1428_v9, %v3705_v21 }
0x21b8   :  { %2444 = vrot.lane.b32.xlu0 %v2441_v56, %s3564_s13  ;;  %v2442_v62 = vmul.f32 %v2441_v56, %v2285_v14 }
0x21b9   :  { %v1430_v23 = vmul.f32 %v1429_v47, %v3899_v38 }
0x222a   :  { %v2445_v57 = vpop.permute.xlu0 %2444 }
0x222b   :  { %v2447_v58 = vmul.f32 %v2445_v57, %v2441_v56 }
0x222d   :  { %2449 = vrot.lane.b32.xlu1 %v2447_v58, %s3565_s14 }
0x229f   :  { %v2450_v63 = vpop.permute.xlu1 %2449 }
0x22a0   :  { %v2452_v5 = vadd.f32 %v2450_v63, %v2442_v62 }
0x22a2   :  { %3478 = vtanh.f32 %v2452_v5 }
0x22af   :  { %v3479_v10 = vpop.eup %3478 }
0x22b0   :  { %2455 = vrot.lane.b32.xlu0 %v3479_v10, %s3564_s13 }
0x22b4   :  { %1432 = vrot.lane.b32.xlu0 %v1429_v47, %s3564_s13 }
0x2322   :  { %v2456_v20 = vpop.permute.xlu0 %2455 }
0x2323   :  { %v2458_v13 = vmul.f32 %v2456_v20, %v2441_v56 }
0x2325   :  { %2460 = vrot.lane.b32.xlu1 %v2458_v13, %s3565_s14 }
0x2326   :  { %v1433_v15 = vpop.permute.xlu0 %1432 }
0x2327   :  { %v1435_v18 = vmul.f32 %v1433_v15, %v1429_v47 }
0x2329   :  { %1437 = vrot.lane.b32.xlu0 %v1435_v18, %s3565_s14 }
0x2397   :  { %v2461_v22 = vpop.permute.xlu1 %2460 }
0x2398   :  { %3370 = vmatmul.mubr.msk.f32.vlgmr.msra.gmra.mxu0 %vm81_vm5, %v2461_v22 }
0x2399   :  { %3384 = vmatpush3.msra.mxu0 %v3905_v39  ;;  %3391 = vmatprep.mubr.msk.f32.mxu0 %vm3562_vm0, %v3561_v0 }
0x239a   :  { %3385 = vmatprep.subr.mxu0 %v3561_v0 }
0x239b   :  { %v1438_v24 = vpop.permute.xlu0 %1437  ;;  %3386 = vmatpush3.msra.mxu0 %v3913_v41 }
0x239c   :  { %v1440_v25 = vadd.f32 %v1438_v24, %v1430_v23  ;;  %3387 = vmatprep.subr.mxu0 %v3561_v0 }
0x239d   :  { %3388 = vmatpush3.msra.mxu0 %v3917_v43 }
0x239e   :  { %3480 = vtanh.f32 %v1440_v25  ;;  %3389 = vmatprep.subr.mxu0 %v3561_v0 }
0x239f   :  { %3390 = vmatpush3.msra.mxu0 %v3921_v44 }
0x23a0   :  { %3405 = vmatprep.subr.mxu0 %v3561_v0 }
0x23ab   :  { %v3481_v39 = vpop.eup %3480 }
0x23ac   :  { %1443 = vrot.lane.b32.xlu0 %v3481_v39, %s3564_s13 }
0x241e   :  { %v1444_v30 = vpop.permute.xlu0 %1443 }
0x241f   :  { %v1446_v31 = vmul.f32 %v1444_v30, %v1429_v47 }
0x2458   :  { %v2530_v38 = vpop.f32.mrf.mxu0 }
0x2459   :  { %v2601_v1 = vadd.f32 %v4076_v19, %v2530_v38 }
0x245a   :  { %v3371_v26 = vpop.f32.mrf.mxu0 }
0x245b   :  { %v2604_v41 = vadd.f32 %v4061_v54, %v2601_v1 }
0x245d   :  { %v2605_v27 = vmul.f32 %v2604_v41, %v3701_v16 }
0x245f   :  { %3482 = vtanh.f32 %v2605_v27 }
0x246c   :  { %v3483_v43 = vpop.eup %3482 }
0x246d   :  { %v2607_v11 = vmul.f32 %v3483_v43, %v3701_v16 }
0x246f   :  { %v2608_v28 = vadd.f32 %v2607_v11, %v3705_v21 }
0x2471   :  { %2611 = vrot.lane.b32.xlu1 %v2608_v28, %s3564_s13  ;;  %v2609_v6 = vmul.f32 %v2608_v28, %v2452_v5 }
0x24e3   :  { %v2612_v44 = vpop.permute.xlu1 %2611 }
0x24e4   :  { %v2614_v2 = vmul.f32 %v2612_v44, %v2608_v28 }
0x24e6   :  { %2616 = vrot.lane.b32.xlu1 %v2614_v2, %s3565_s14 }
0x2558   :  { %v2617_v7 = vpop.permute.xlu1 %2616 }
0x2559   :  { %v2619_v19 = vadd.f32 %v2617_v7, %v2609_v6 }
0x255b   :  { %3484 = vtanh.f32 %v2619_v19 }
0x2568   :  { %v3485_v29 = vpop.eup %3484 }
0x2569   :  { %2622 = vrot.lane.b32.xlu1 %v3485_v29, %s3564_s13 }
0x256d   :  { %2702 = vrot.lane.b32.xlu1 %v1446_v31, %s3565_s14 }
0x25db   :  { %v2623_v33 = vpop.permute.xlu1 %2622 }
0x25dc   :  { %v2625_v3 = vmul.f32 %v2623_v33, %v2608_v28 }
0x25de   :  { %2627 = vrot.lane.b32.xlu0 %v2625_v3, %s3565_s14 }
0x25df   :  { %v2703_v34 = vpop.permute.xlu1 %2702 }
0x25e0   :  { %3403 = vmatmul.mubr.msk.f32.vlgmr.msra.gmra.mxu1 %vm81_vm5, %v2703_v34 }
0x2650   :  { %v2628_v35 = vpop.permute.xlu0 %2627 }
0x2651   :  { %3392 = vmatmul.mubr.msk.f32.vlgmr.msra.gmra.mxu0 %vm81_vm5, %v2628_v35 }
0x2652   :  { %3413 = vmatprep.mubr.msk.f32.mxu0 %vm3562_vm0, %v3561_v0 }
0x26a0   :  { %v2772_v36 = vpop.f32.mrf.mxu1 }
0x26a2   :  { %v3404_v4 = vpop.f32.mrf.mxu1 }
0x2711   :  { %v2697_v37 = vpop.f32.mrf.mxu0 }
0x2712   :  { %v2773_v12 = vadd.f32 %v2772_v36, %v2697_v37 }
0x2713   :  { %v3393_v40 = vpop.f32.mrf.mxu0 }
0x2714   :  { %v2776_v14 = vadd.f32 %v4061_v54, %v2773_v12  ;;  %v2801_v54 = vld [vmem:[%s4251_s7 + $0x18] sm:$0xff] }
0x2715   :  { %3406 = vmatpush3.msra.mxu0 %v2801_v54 }
0x2716   :  { %v2777_v45 = vmul.f32 %v2776_v14, %v3701_v16  ;;  %3407 = vmatprep.subr.mxu0 %v3561_v0 }
0x2718   :  { %3486 = vtanh.f32 %v2777_v45 }
0x2725   :  { %v3487_v46 = vpop.eup %3486 }
0x2726   :  { %v2779_v48 = vmul.f32 %v3487_v46, %v3701_v16  ;;  %v2800_v16 = vld [vmem:[%s4251_s7 + $0x10] sm:$0xff] }
0x2727   :  { %3408 = vmatpush3.msra.mxu0 %v2800_v16 }
0x2728   :  { %v2780_v49 = vadd.f32 %v2779_v48, %v3705_v21  ;;  %v2799_v21 = vld [vmem:[%s4251_s7 + $0x8] sm:$0xff]  ;;  %3409 = vmatprep.subr.mxu0 %v3561_v0  ;;  %s3531_s7 = scalar_lea.vmem %s2893_s22, 32 }
0x2729   :  { %3410 = vmatpush3.msra.mxu0 %v2799_v21  ;;  %p3532_p10 = scmp.ne.s32.totalorder %s2893_s22, %s3531_s7  ;;  %p3537_p12 = scmp.lt.s32.totalorder %s3531_s7, %s3531_s7 }
0x272a   :  { %2783 = vrot.lane.b32.xlu0 %v2780_v49, %s3564_s13  ;;  %v2781_v52 = vmul.f32 %v2780_v49, %v2619_v19  ;;  %3411 = vmatprep.subr.mxu0 %v3561_v0 }
0x272b   :  { %3412 = vmatpush3.msra.mxu0 %v2798_v55  ;;  %p3538_p13 = por %p3537_p12, %p3536_p11 }
0x272d   :  { %p3539_p0 = pnand %p3538_p13, %p3532_p10 }
0x279c   :  { %v2784_v50 = vpop.permute.xlu0 %2783 }
0x279d   :  { %v2786_v51 = vmul.f32 %v2784_v50, %v2780_v49 }
0x279f   :  { %2788 = vrot.lane.b32.xlu1 %v2786_v51, %s3565_s14 }
0x2811   :  { %v2789_v53 = vpop.permute.xlu1 %2788 }
0x2812   :  { %v2791_v32 = vadd.f32 %v2789_v53, %v2781_v52 }
0x2814   :  { %3488 = vtanh.f32 %v2791_v32 }
0x2821   :  { %v3489_v42 = vpop.eup %3488 }
0x2822   :  { %2794 = vrot.lane.b32.xlu0 %v3489_v42, %s3564_s13 }
0x2894   :  { %v2795_v56 = vpop.permute.xlu0 %2794 }
0x2895   :  { %v2797_v57 = vmul.f32 %v2795_v56, %v2780_v49 }
0x2897   :  { %2810 = vrot.lane.b32.xlu1 %v2797_v57, %s3565_s14 }
0x2909   :  { %v2811_v58 = vpop.permute.xlu1 %2810 }
0x290a   :  { %3414 = vmatmul.mubr.msk.f32.vlgmr.msra.gmra.mxu0 %vm81_vm5, %v2811_v58 }
0x29ca   :  { %v2880_v59 = vpop.f32.mrf.mxu0 }
0x29cb   :  { %v2881_v60 = vadd.f32 %v2934_v17, %v2880_v59 }
0x29cc   :  { %v3415_v61 = vpop.f32.mrf.mxu0 }
0x29cd   :  { %2885 = vst.msk [vmem:[#allocation7] sm:$0x3] %vm2884_vm6, %v2881_v60 }
0x29ce   :  { %3542 = shalt.err (!%p3539_p0)
}
0x29cf   :  { %2895 = dma.vmem_to_hbm [thread:$0]  %s2893_s22, 32, %s4253_s9, [#allocation4]  }
0x29d0   :  { %3555 = dma.done.wait [#allocation4], 32  }
0x29d1   :  { %3556 = vsyncadd [#allocation4], 4294967264 }
0x29d2   :  { %2899 = vsyncpa [#allocation3], 1 }
0x29d3   :  { %2900 = vsyncpa [#allocation6], 1 }
0x29d4   :  { %2901 = vsyncpa [#allocation4], 1 }

</bundles_post_ra>
